<compile_context>
chip_gen: v6e
topology: v6e:2x2x1
jax: 0.10.0
libtpu: 0.0.40
codegen_flags: <defaults>
</compile_context>

<pallas_src>
import functools

import jax
import jax.numpy as jnp
import numpy as np
from jax.experimental import pallas as pl
from jax.experimental.pallas import tpu as pltpu


# ----------------------------------------------------------------------------
# Fully fused NetG forward kernel (single invocation, no grid).
# PyTorch gate order along the packed 3H axis: r (reset), z (update), n (new).
#
# bias_ref rows (each padded to width W = max(3H, E, D)):
#   0: enc bih + [bhh_r, bhh_z, 0]   (folded input-projection bias, encoder)
#   1: dec bih + [bhh_r, bhh_z, 0]   (folded input-projection bias, decoder)
#   2: enc bhh_n (width H)           3: dec bhh_n (width H)
#   4: fc  bias  (width E)           5: fc2 bias  (width D)
#   6,7: zero padding
# ----------------------------------------------------------------------------
def _netg_kernel(x_ref, noise_ref, fc_w_ref, wih_ref, whh_ref, fc2_w_ref,
                 bias_ref, out_ref, y_scr, *, T, Bp, H, E, D):
    f32 = jnp.float32
    H2, H3 = 2 * H, 3 * H
    R = T * Bp                      # rows per sequence (time-major, Bp-aligned)

    # ---- unpack bias slab (one-time, outside the recurrence) ---------------
    enc_bi = bias_ref[0:1, :H3]                       # (1, 3H)
    dec_bi = bias_ref[1:2, :H3]
    enc_bhn = jnp.broadcast_to(bias_ref[2:3, :H], (Bp, H))   # hoisted broadcast
    dec_bhn = jnp.broadcast_to(bias_ref[3:4, :H], (Bp, H))
    fc_b = bias_ref[4:5, :E]                          # (1, E)
    fc2_b = bias_ref[5:6, :D]                         # (1, D)

    # ---- fc + ReLU for BOTH sequences in one matmul -------------------------
    x_e = jnp.maximum(
        jnp.dot(x_ref[...], fc_w_ref[...], preferred_element_type=f32) + fc_b,
        0.0)                                          # (2*R, E)

    # ---- hoisted input-to-hidden projections (one matmul per GRU) ----------
    # Folded bias = bih + [bhh_r, bhh_z, 0]; bhh_n handled inside the step
    # because of the r * (h@Whh_n + bhh_n) term in PyTorch's formulation.
    ip = jnp.dot(x_e[:R, :], wih_ref[:E, :],
                 preferred_element_type=f32) + enc_bi           # (R, 3H)
    i_f = jnp.dot(x_e[R:, :], wih_ref[E:, :],
                  preferred_element_type=f32) + dec_bi          # (R, 3H)

    enc_whh = whh_ref[:H, :]                          # (H, 3H)
    dec_whh = whh_ref[H:, :]

    def gru_step(i_t, h_prev, whh, bhn):
        # i_t: (Bp, 3H) precomputed x@Wih + folded bias; h_prev: (Bp, H)
        hh = jnp.dot(h_prev, whh, preferred_element_type=f32)   # (Bp, 3H)
        rz = jax.nn.sigmoid(i_t[:, :H2] + hh[:, :H2])           # one EUP issue
        r = rz[:, :H]
        z = rz[:, H:]
        n = jnp.tanh(i_t[:, H2:] + r * (hh[:, H2:] + bhn))
        return n + z * (h_prev - n)     # == (1-z)*n + z*h_prev, one mul fewer

    # ---- encoder GRU: only the final hidden state is needed ----------------
    h = jnp.zeros((Bp, H), f32)
    for t in range(T):                              # static unroll (T small)
        h = gru_step(ip[t * Bp:(t + 1) * Bp, :], h, enc_whh, enc_bhn)

    # ---- decoder GRU over right-shifted inputs ------------------------------
    # hidden = h_t + noise; step t uses Xf_e[t-1] (zero input -> bias only @ t==0)
    h = h + noise_ref[...]
    i0 = jnp.broadcast_to(dec_bi, (Bp, H3))
    for t in range(T):
        i_t = i0 if t == 0 else i_f[(t - 1) * Bp:t * Bp, :]
        h = gru_step(i_t, h, dec_whh, dec_bhn)
        y_scr[t * Bp:(t + 1) * Bp, :] = h           # aligned (8, H) store

    # ---- final fc for all timesteps at once ---------------------------------
    out_ref[...] = (jnp.dot(y_scr[...], fc2_w_ref[...],
                            preferred_element_type=f32) + fc2_b)


# ----------------------------------------------------------------------------
# Parameter construction (deterministic, synthetic, gate-packed layout)
# ----------------------------------------------------------------------------
def init_params(key, data_dim, emb_dim, hid_dim):
    ks = jax.random.split(key, 12)
    u = lambda k, shape, s: jax.random.uniform(k, shape, jnp.float32, -s, s)
    sc_fc = 1.0 / np.sqrt(data_dim)
    sc_rnn = 1.0 / np.sqrt(hid_dim)
    sc_fc2 = 1.0 / np.sqrt(hid_dim)
    return {
        # nn.Linear(data_dim, emb_dim)   (stored transposed: (Din, Dout))
        "fc_w": u(ks[0], (data_dim, emb_dim), sc_fc),
        "fc_b": u(ks[1], (1, emb_dim), sc_fc),
        # GRU encoder, single layer, gates packed [r | z | n] along last dim
        "enc_wih": u(ks[2], (emb_dim, 3 * hid_dim), sc_rnn),
        "enc_whh": u(ks[3], (hid_dim, 3 * hid_dim), sc_rnn),
        "enc_bih": u(ks[4], (1, 3 * hid_dim), sc_rnn),
        "enc_bhh": u(ks[5], (1, 3 * hid_dim), sc_rnn),
        # GRU decoder
        "dec_wih": u(ks[6], (emb_dim, 3 * hid_dim), sc_rnn),
        "dec_whh": u(ks[7], (hid_dim, 3 * hid_dim), sc_rnn),
        "dec_bih": u(ks[8], (1, 3 * hid_dim), sc_rnn),
        "dec_bhh": u(ks[9], (1, 3 * hid_dim), sc_rnn),
        # nn.Linear(hid_dim, data_dim)
        "fc2_w": u(ks[10], (hid_dim, data_dim), sc_fc2),
        "fc2_b": u(ks[11], (1, data_dim), sc_fc2),
    }


def _fold_bias(bih, bhh, H):
    """bih/bhh: (1, 3H).  Fold bhh into bih for r and z gates; return bhh_n."""
    bi = jnp.concatenate([bih[:, :2 * H] + bhh[:, :2 * H], bih[:, 2 * H:]], axis=1)
    return bi, bhh[:, 2 * H:]


def _pad_cols(a, width):
    return jnp.pad(a, ((0, 0), (0, width - a.shape[1])))


# ----------------------------------------------------------------------------
# NetG forward: one fused pallas_call + tiny host layout/packing glue
# ----------------------------------------------------------------------------
# TODO(synk): implements num_layers=1 GRUs (args['num_layers']==1); stacked
#             layers would add an outer layer loop feeding hidden sequences.
def netg_forward(params, X_p, X_f, noise):
    B, T = X_p.shape[0], X_p.shape[1]
    Xp = X_p.reshape(B, T, -1)                           # flatten(2)
    Xf = X_f.reshape(B, T, -1)
    D = Xp.shape[-1]
    H = params["enc_whh"].shape[0]
    E = params["fc_w"].shape[1]

    # Pad batch to a full sublane tile so every per-step block is (8, lane).
    Bp = max(8, ((B + 7) // 8) * 8)
    pad_b = Bp - B

    # Time-major, rows = t*Bp + b; Xp and Xf stacked along rows -> one fc pass.
    def to_tm(x):
        x = jnp.pad(x, ((0, pad_b), (0, 0), (0, 0)))     # zero-pad batch
        return jnp.transpose(x, (1, 0, 2)).reshape(T * Bp, D)

    x_all = jnp.concatenate([to_tm(Xp), to_tm(Xf)], axis=0)      # (2*T*Bp, D)
    noise_p = jnp.pad(noise[0], ((0, pad_b), (0, 0)))            # (Bp, H)

    # Pack GRU weights along rows (sublane-aligned slices inside the kernel).
    wih_pack = jnp.concatenate([params["enc_wih"], params["dec_wih"]], axis=0)
    whh_pack = jnp.concatenate([params["enc_whh"], params["dec_whh"]], axis=0)

    # One bias slab: folded bi (enc/dec), bhh_n (enc/dec), fc bias, fc2 bias.
    enc_bi, enc_bhn = _fold_bias(params["enc_bih"], params["enc_bhh"], H)
    dec_bi, dec_bhn = _fold_bias(params["dec_bih"], params["dec_bhh"], H)
    W = max(3 * H, E, D)
    bias_pack = jnp.concatenate([
        _pad_cols(enc_bi, W), _pad_cols(dec_bi, W),
        _pad_cols(enc_bhn, W), _pad_cols(dec_bhn, W),
        _pad_cols(params["fc_b"], W), _pad_cols(params["fc2_b"], W),
        jnp.zeros((2, W), jnp.float32)], axis=0)                  # (8, W)

    kernel = functools.partial(_netg_kernel, T=T, Bp=Bp, H=H, E=E, D=D)
    vmem_spec = pl.BlockSpec(memory_space=pltpu.MemorySpace.VMEM)

    out_tm = pl.pallas_call(
        kernel,
        out_shape=jax.ShapeDtypeStruct((T * Bp, D), jnp.float32),
        in_specs=[vmem_spec] * 7,
        out_specs=vmem_spec,
        scratch_shapes=[pltpu.VMEM((T * Bp, H), jnp.float32)],
    )(x_all, noise_p,
      params["fc_w"], wih_pack, whh_pack, params["fc2_w"], bias_pack)

    # back to batch-first (B, T, data_dim), dropping padded batch rows
    return jnp.transpose(out_tm.reshape(T, Bp, D)[:, :B, :], (1, 0, 2))


# ----------------------------------------------------------------------------
# Pure-JAX reference (PyTorch GRU formulation, unfolded biases, unpadded B)
# ----------------------------------------------------------------------------
def _gru_ref(x_btf, h0, wih, whh, bih, bhh, H):
    def step(h, x_t):
        gi = x_t @ wih + bih                 # (B, 3H)
        gh = h @ whh + bhh                   # (B, 3H)
        r = jax.nn.sigmoid(gi[:, :H] + gh[:, :H])
        z = jax.nn.sigmoid(gi[:, H:2 * H] + gh[:, H:2 * H])
        n = jnp.tanh(gi[:, 2 * H:] + r * gh[:, 2 * H:])
        h_new = (1.0 - z) * n + z * h
        return h_new, h_new

    h_last, ys = jax.lax.scan(step, h0, jnp.transpose(x_btf, (1, 0, 2)))
    return jnp.transpose(ys, (1, 0, 2)), h_last


def netg_reference(params, X_p, X_f, noise):
    B, T = X_p.shape[0], X_p.shape[1]
    Xp = X_p.reshape(B, T, -1)
    Xf = X_f.reshape(B, T, -1)
    H = params["enc_whh"].shape[0]
    Xp_e = jnp.maximum(Xp @ params["fc_w"] + params["fc_b"][0], 0.0)
    Xf_e = jnp.maximum(Xf @ params["fc_w"] + params["fc_b"][0], 0.0)
    _, h_t = _gru_ref(Xp_e, jnp.zeros((B, H), jnp.float32),
                      params["enc_wih"], params["enc_whh"],
                      params["enc_bih"], params["enc_bhh"], H)
    Xf_shft = jnp.concatenate(
        [jnp.zeros((B, 1, Xf_e.shape[-1]), jnp.float32), Xf_e[:, :-1, :]], axis=1)
    hidden = h_t + noise[0]
    Y_f, _ = _gru_ref(Xf_shft, hidden,
                      params["dec_wih"], params["dec_whh"],
                      params["dec_bih"], params["dec_bhh"], H)
    return Y_f @ params["fc2_w"] + params["fc2_b"][0]


if __name__ == "__main__":
    # args: data_dim=16, emb_dim=32, RNN_hid_dim=32, num_layers=1
    B, T = 2, 8
    data_dim, emb_dim, hid_dim, num_layers = 16, 32, 32, 1

    key = jax.random.PRNGKey(0)
    k_p, k_f, k_n, k_w = jax.random.split(key, 4)
    # X_p / X_f have trailing dims that flatten(2) collapses to data_dim
    X_p = jax.random.normal(k_p, (B, T, 4, 4), jnp.float32)
    X_f = jax.random.normal(k_f, (B, T, 4, 4), jnp.float32)
    noise = 0.1 * jax.random.normal(k_n, (num_layers, B, hid_dim), jnp.float32)

    params = init_params(k_w, data_dim, emb_dim, hid_dim)

    fwd = jax.jit(netg_forward)
    out = fwd(params, X_p, X_f, noise)
    out = jax.block_until_ready(out)

    ref = netg_reference(params, X_p, X_f, noise)
    np.testing.assert_allclose(np.asarray(out), np.asarray(ref), atol=1e-4, rtol=1e-4)
    assert out.shape == (B, T, data_dim)

    print("KERNEL_OK")
</pallas_src>

<mosaic_0001>
module attributes {stable_mosaic.version = 11 : i64} {
  func.func @_netg_kernel(%arg0: memref<128x16xf32, #tpu.memory_space<vmem>>, %arg1: memref<8x32xf32, #tpu.memory_space<vmem>>, %arg2: memref<16x32xf32, #tpu.memory_space<vmem>>, %arg3: memref<64x96xf32, #tpu.memory_space<vmem>>, %arg4: memref<64x96xf32, #tpu.memory_space<vmem>>, %arg5: memref<32x16xf32, #tpu.memory_space<vmem>>, %arg6: memref<8x96xf32, #tpu.memory_space<vmem>>, %arg7: memref<64x16xf32, #tpu.memory_space<vmem>>, %arg8: memref<64x32xf32, #tpu.memory_space<vmem>>) attributes {dimension_semantics = [], scalar_prefetch = 0 : i64, scratch_operands = 1 : i64, tpu.core_type = #tpu.core_type<tc>} {
    %c0 = arith.constant 0 : index
    %c0_0 = arith.constant 0 : index
    %0 = vector.load %arg6[%c0, %c0_0] : memref<8x96xf32, #tpu.memory_space<vmem>>, vector<1x96xf32>
    %c1 = arith.constant 1 : index
    %c0_1 = arith.constant 0 : index
    %1 = vector.load %arg6[%c1, %c0_1] : memref<8x96xf32, #tpu.memory_space<vmem>>, vector<1x96xf32>
    %c2 = arith.constant 2 : index
    %c0_2 = arith.constant 0 : index
    %2 = vector.load %arg6[%c2, %c0_2] : memref<8x96xf32, #tpu.memory_space<vmem>>, vector<1x32xf32>
    %3 = vector.shape_cast %2 : vector<1x32xf32> to vector<1x32xf32>
    %4 = vector.broadcast %3 : vector<1x32xf32> to vector<8x32xf32>
    %c3 = arith.constant 3 : index
    %c0_3 = arith.constant 0 : index
    %5 = vector.load %arg6[%c3, %c0_3] : memref<8x96xf32, #tpu.memory_space<vmem>>, vector<1x32xf32>
    %6 = vector.shape_cast %5 : vector<1x32xf32> to vector<1x32xf32>
    %7 = vector.broadcast %6 : vector<1x32xf32> to vector<8x32xf32>
    %c4 = arith.constant 4 : index
    %c0_4 = arith.constant 0 : index
    %8 = vector.load %arg6[%c4, %c0_4] : memref<8x96xf32, #tpu.memory_space<vmem>>, vector<1x32xf32>
    %c5 = arith.constant 5 : index
    %c0_5 = arith.constant 0 : index
    %9 = vector.load %arg6[%c5, %c0_5] : memref<8x96xf32, #tpu.memory_space<vmem>>, vector<1x16xf32>
    %c0_6 = arith.constant 0 : index
    %c0_7 = arith.constant 0 : index
    %10 = vector.load %arg0[%c0_6, %c0_7] : memref<128x16xf32, #tpu.memory_space<vmem>>, vector<128x16xf32>
    %c0_8 = arith.constant 0 : index
    %c0_9 = arith.constant 0 : index
    %11 = vector.load %arg2[%c0_8, %c0_9] : memref<16x32xf32, #tpu.memory_space<vmem>>, vector<16x32xf32>
    %cst = arith.constant dense<0.000000e+00> : vector<128x32xf32>
    %12 = tpu.matmul %10, %11, %cst {dimension_numbers = #tpu.dot_dimension_numbers<[1], [0], [0], [1], [0, 0, 1, 1], [], []>} : vector<128x16xf32>, vector<16x32xf32>, vector<128x32xf32> -> vector<128x32xf32>
    %13 = vector.broadcast %8 : vector<1x32xf32> to vector<128x32xf32>
    %14 = arith.addf %12, %13 : vector<128x32xf32>
    %cst_10 = arith.constant 0.000000e+00 : f32
    %15 = vector.broadcast %cst_10 : f32 to vector<128x32xf32>
    %16 = arith.maximumf %14, %15 : vector<128x32xf32>
    %17 = vector.extract_strided_slice %16 {offsets = [0, 0], sizes = [64, 32], strides = [1, 1]} : vector<128x32xf32> to vector<64x32xf32>
    %c0_11 = arith.constant 0 : index
    %c0_12 = arith.constant 0 : index
    %18 = vector.load %arg3[%c0_11, %c0_12] : memref<64x96xf32, #tpu.memory_space<vmem>>, vector<32x96xf32>
    %cst_13 = arith.constant dense<0.000000e+00> : vector<64x96xf32>
    %19 = tpu.matmul %17, %18, %cst_13 {dimension_numbers = #tpu.dot_dimension_numbers<[1], [0], [0], [1], [0, 0, 1, 1], [], []>} : vector<64x32xf32>, vector<32x96xf32>, vector<64x96xf32> -> vector<64x96xf32>
    %20 = vector.broadcast %0 : vector<1x96xf32> to vector<64x96xf32>
    %21 = arith.addf %19, %20 : vector<64x96xf32>
    %22 = vector.extract_strided_slice %16 {offsets = [64, 0], sizes = [64, 32], strides = [1, 1]} : vector<128x32xf32> to vector<64x32xf32>
    %c32 = arith.constant 32 : index
    %c0_14 = arith.constant 0 : index
    %23 = vector.load %arg3[%c32, %c0_14] : memref<64x96xf32, #tpu.memory_space<vmem>>, vector<32x96xf32>
    %cst_15 = arith.constant dense<0.000000e+00> : vector<64x96xf32>
    %24 = tpu.matmul %22, %23, %cst_15 {dimension_numbers = #tpu.dot_dimension_numbers<[1], [0], [0], [1], [0, 0, 1, 1], [], []>} : vector<64x32xf32>, vector<32x96xf32>, vector<64x96xf32> -> vector<64x96xf32>
    %25 = vector.broadcast %1 : vector<1x96xf32> to vector<64x96xf32>
    %26 = arith.addf %24, %25 : vector<64x96xf32>
    %c0_16 = arith.constant 0 : index
    %c0_17 = arith.constant 0 : index
    %27 = vector.load %arg4[%c0_16, %c0_17] : memref<64x96xf32, #tpu.memory_space<vmem>>, vector<32x96xf32>
    %c32_18 = arith.constant 32 : index
    %c0_19 = arith.constant 0 : index
    %28 = vector.load %arg4[%c32_18, %c0_19] : memref<64x96xf32, #tpu.memory_space<vmem>>, vector<32x96xf32>
    %cst_20 = arith.constant 0.000000e+00 : f32
    %29 = vector.broadcast %cst_20 : f32 to vector<8x32xf32>
    %30 = vector.extract_strided_slice %21 {offsets = [0, 0], sizes = [8, 96], strides = [1, 1]} : vector<64x96xf32> to vector<8x96xf32>
    %cst_21 = arith.constant dense<0.000000e+00> : vector<8x96xf32>
    %31 = tpu.matmul %29, %27, %cst_21 {dimension_numbers = #tpu.dot_dimension_numbers<[1], [0], [0], [1], [0, 0, 1, 1], [], []>} : vector<8x32xf32>, vector<32x96xf32>, vector<8x96xf32> -> vector<8x96xf32>
    %32 = vector.extract_strided_slice %30 {offsets = [0, 0], sizes = [8, 64], strides = [1, 1]} : vector<8x96xf32> to vector<8x64xf32>
    %33 = vector.extract_strided_slice %31 {offsets = [0, 0], sizes = [8, 64], strides = [1, 1]} : vector<8x96xf32> to vector<8x64xf32>
    %34 = arith.addf %32, %33 : vector<8x64xf32>
    %35 = arith.negf %34 : vector<8x64xf32>
    %36 = math.exp %35 : vector<8x64xf32>
    %cst_22 = arith.constant 1.000000e+00 : f32
    %37 = vector.broadcast %cst_22 : f32 to vector<8x64xf32>
    %38 = arith.addf %37, %36 : vector<8x64xf32>
    %39 = arith.divf %37, %38 : vector<8x64xf32>
    %40 = vector.extract_strided_slice %39 {offsets = [0, 0], sizes = [8, 32], strides = [1, 1]} : vector<8x64xf32> to vector<8x32xf32>
    %41 = vector.extract_strided_slice %39 {offsets = [0, 32], sizes = [8, 32], strides = [1, 1]} : vector<8x64xf32> to vector<8x32xf32>
    %42 = vector.extract_strided_slice %30 {offsets = [0, 64], sizes = [8, 32], strides = [1, 1]} : vector<8x96xf32> to vector<8x32xf32>
    %43 = vector.extract_strided_slice %31 {offsets = [0, 64], sizes = [8, 32], strides = [1, 1]} : vector<8x96xf32> to vector<8x32xf32>
    %44 = arith.addf %43, %4 : vector<8x32xf32>
    %45 = arith.mulf %40, %44 : vector<8x32xf32>
    %46 = arith.addf %42, %45 : vector<8x32xf32>
    %47 = math.tanh %46 : vector<8x32xf32>
    %48 = arith.subf %29, %47 : vector<8x32xf32>
    %49 = arith.mulf %41, %48 : vector<8x32xf32>
    %50 = arith.addf %47, %49 : vector<8x32xf32>
    %51 = vector.extract_strided_slice %21 {offsets = [8, 0], sizes = [8, 96], strides = [1, 1]} : vector<64x96xf32> to vector<8x96xf32>
    %cst_23 = arith.constant dense<0.000000e+00> : vector<8x96xf32>
    %52 = tpu.matmul %50, %27, %cst_23 {dimension_numbers = #tpu.dot_dimension_numbers<[1], [0], [0], [1], [0, 0, 1, 1], [], []>} : vector<8x32xf32>, vector<32x96xf32>, vector<8x96xf32> -> vector<8x96xf32>
    %53 = vector.extract_strided_slice %51 {offsets = [0, 0], sizes = [8, 64], strides = [1, 1]} : vector<8x96xf32> to vector<8x64xf32>
    %54 = vector.extract_strided_slice %52 {offsets = [0, 0], sizes = [8, 64], strides = [1, 1]} : vector<8x96xf32> to vector<8x64xf32>
    %55 = arith.addf %53, %54 : vector<8x64xf32>
    %56 = arith.negf %55 : vector<8x64xf32>
    %57 = math.exp %56 : vector<8x64xf32>
    %cst_24 = arith.constant 1.000000e+00 : f32
    %58 = vector.broadcast %cst_24 : f32 to vector<8x64xf32>
    %59 = arith.addf %58, %57 : vector<8x64xf32>
    %60 = arith.divf %58, %59 : vector<8x64xf32>
    %61 = vector.extract_strided_slice %60 {offsets = [0, 0], sizes = [8, 32], strides = [1, 1]} : vector<8x64xf32> to vector<8x32xf32>
    %62 = vector.extract_strided_slice %60 {offsets = [0, 32], sizes = [8, 32], strides = [1, 1]} : vector<8x64xf32> to vector<8x32xf32>
    %63 = vector.extract_strided_slice %51 {offsets = [0, 64], sizes = [8, 32], strides = [1, 1]} : vector<8x96xf32> to vector<8x32xf32>
    %64 = vector.extract_strided_slice %52 {offsets = [0, 64], sizes = [8, 32], strides = [1, 1]} : vector<8x96xf32> to vector<8x32xf32>
    %65 = arith.addf %64, %4 : vector<8x32xf32>
    %66 = arith.mulf %61, %65 : vector<8x32xf32>
    %67 = arith.addf %63, %66 : vector<8x32xf32>
    %68 = math.tanh %67 : vector<8x32xf32>
    %69 = arith.subf %50, %68 : vector<8x32xf32>
    %70 = arith.mulf %62, %69 : vector<8x32xf32>
    %71 = arith.addf %68, %70 : vector<8x32xf32>
    %72 = vector.extract_strided_slice %21 {offsets = [16, 0], sizes = [8, 96], strides = [1, 1]} : vector<64x96xf32> to vector<8x96xf32>
    %cst_25 = arith.constant dense<0.000000e+00> : vector<8x96xf32>
    %73 = tpu.matmul %71, %27, %cst_25 {dimension_numbers = #tpu.dot_dimension_numbers<[1], [0], [0], [1], [0, 0, 1, 1], [], []>} : vector<8x32xf32>, vector<32x96xf32>, vector<8x96xf32> -> vector<8x96xf32>
    %74 = vector.extract_strided_slice %72 {offsets = [0, 0], sizes = [8, 64], strides = [1, 1]} : vector<8x96xf32> to vector<8x64xf32>
    %75 = vector.extract_strided_slice %73 {offsets = [0, 0], sizes = [8, 64], strides = [1, 1]} : vector<8x96xf32> to vector<8x64xf32>
    %76 = arith.addf %74, %75 : vector<8x64xf32>
    %77 = arith.negf %76 : vector<8x64xf32>
    %78 = math.exp %77 : vector<8x64xf32>
    %cst_26 = arith.constant 1.000000e+00 : f32
    %79 = vector.broadcast %cst_26 : f32 to vector<8x64xf32>
    %80 = arith.addf %79, %78 : vector<8x64xf32>
    %81 = arith.divf %79, %80 : vector<8x64xf32>
    %82 = vector.extract_strided_slice %81 {offsets = [0, 0], sizes = [8, 32], strides = [1, 1]} : vector<8x64xf32> to vector<8x32xf32>
    %83 = vector.extract_strided_slice %81 {offsets = [0, 32], sizes = [8, 32], strides = [1, 1]} : vector<8x64xf32> to vector<8x32xf32>
    %84 = vector.extract_strided_slice %72 {offsets = [0, 64], sizes = [8, 32], strides = [1, 1]} : vector<8x96xf32> to vector<8x32xf32>
    %85 = vector.extract_strided_slice %73 {offsets = [0, 64], sizes = [8, 32], strides = [1, 1]} : vector<8x96xf32> to vector<8x32xf32>
    %86 = arith.addf %85, %4 : vector<8x32xf32>
    %87 = arith.mulf %82, %86 : vector<8x32xf32>
    %88 = arith.addf %84, %87 : vector<8x32xf32>
    %89 = math.tanh %88 : vector<8x32xf32>
    %90 = arith.subf %71, %89 : vector<8x32xf32>
    %91 = arith.mulf %83, %90 : vector<8x32xf32>
    %92 = arith.addf %89, %91 : vector<8x32xf32>
    %93 = vector.extract_strided_slice %21 {offsets = [24, 0], sizes = [8, 96], strides = [1, 1]} : vector<64x96xf32> to vector<8x96xf32>
    %cst_27 = arith.constant dense<0.000000e+00> : vector<8x96xf32>
    %94 = tpu.matmul %92, %27, %cst_27 {dimension_numbers = #tpu.dot_dimension_numbers<[1], [0], [0], [1], [0, 0, 1, 1], [], []>} : vector<8x32xf32>, vector<32x96xf32>, vector<8x96xf32> -> vector<8x96xf32>
    %95 = vector.extract_strided_slice %93 {offsets = [0, 0], sizes = [8, 64], strides = [1, 1]} : vector<8x96xf32> to vector<8x64xf32>
    %96 = vector.extract_strided_slice %94 {offsets = [0, 0], sizes = [8, 64], strides = [1, 1]} : vector<8x96xf32> to vector<8x64xf32>
    %97 = arith.addf %95, %96 : vector<8x64xf32>
    %98 = arith.negf %97 : vector<8x64xf32>
    %99 = math.exp %98 : vector<8x64xf32>
    %cst_28 = arith.constant 1.000000e+00 : f32
    %100 = vector.broadcast %cst_28 : f32 to vector<8x64xf32>
    %101 = arith.addf %100, %99 : vector<8x64xf32>
    %102 = arith.divf %100, %101 : vector<8x64xf32>
    %103 = vector.extract_strided_slice %102 {offsets = [0, 0], sizes = [8, 32], strides = [1, 1]} : vector<8x64xf32> to vector<8x32xf32>
    %104 = vector.extract_strided_slice %102 {offsets = [0, 32], sizes = [8, 32], strides = [1, 1]} : vector<8x64xf32> to vector<8x32xf32>
    %105 = vector.extract_strided_slice %93 {offsets = [0, 64], sizes = [8, 32], strides = [1, 1]} : vector<8x96xf32> to vector<8x32xf32>
    %106 = vector.extract_strided_slice %94 {offsets = [0, 64], sizes = [8, 32], strides = [1, 1]} : vector<8x96xf32> to vector<8x32xf32>
    %107 = arith.addf %106, %4 : vector<8x32xf32>
    %108 = arith.mulf %103, %107 : vector<8x32xf32>
    %109 = arith.addf %105, %108 : vector<8x32xf32>
    %110 = math.tanh %109 : vector<8x32xf32>
    %111 = arith.subf %92, %110 : vector<8x32xf32>
    %112 = arith.mulf %104, %111 : vector<8x32xf32>
    %113 = arith.addf %110, %112 : vector<8x32xf32>
    %114 = vector.extract_strided_slice %21 {offsets = [32, 0], sizes = [8, 96], strides = [1, 1]} : vector<64x96xf32> to vector<8x96xf32>
    %cst_29 = arith.constant dense<0.000000e+00> : vector<8x96xf32>
    %115 = tpu.matmul %113, %27, %cst_29 {dimension_numbers = #tpu.dot_dimension_numbers<[1], [0], [0], [1], [0, 0, 1, 1], [], []>} : vector<8x32xf32>, vector<32x96xf32>, vector<8x96xf32> -> vector<8x96xf32>
    %116 = vector.extract_strided_slice %114 {offsets = [0, 0], sizes = [8, 64], strides = [1, 1]} : vector<8x96xf32> to vector<8x64xf32>
    %117 = vector.extract_strided_slice %115 {offsets = [0, 0], sizes = [8, 64], strides = [1, 1]} : vector<8x96xf32> to vector<8x64xf32>
    %118 = arith.addf %116, %117 : vector<8x64xf32>
    %119 = arith.negf %118 : vector<8x64xf32>
    %120 = math.exp %119 : vector<8x64xf32>
    %cst_30 = arith.constant 1.000000e+00 : f32
    %121 = vector.broadcast %cst_30 : f32 to vector<8x64xf32>
    %122 = arith.addf %121, %120 : vector<8x64xf32>
    %123 = arith.divf %121, %122 : vector<8x64xf32>
    %124 = vector.extract_strided_slice %123 {offsets = [0, 0], sizes = [8, 32], strides = [1, 1]} : vector<8x64xf32> to vector<8x32xf32>
    %125 = vector.extract_strided_slice %123 {offsets = [0, 32], sizes = [8, 32], strides = [1, 1]} : vector<8x64xf32> to vector<8x32xf32>
    %126 = vector.extract_strided_slice %114 {offsets = [0, 64], sizes = [8, 32], strides = [1, 1]} : vector<8x96xf32> to vector<8x32xf32>
    %127 = vector.extract_strided_slice %115 {offsets = [0, 64], sizes = [8, 32], strides = [1, 1]} : vector<8x96xf32> to vector<8x32xf32>
    %128 = arith.addf %127, %4 : vector<8x32xf32>
    %129 = arith.mulf %124, %128 : vector<8x32xf32>
    %130 = arith.addf %126, %129 : vector<8x32xf32>
    %131 = math.tanh %130 : vector<8x32xf32>
    %132 = arith.subf %113, %131 : vector<8x32xf32>
    %133 = arith.mulf %125, %132 : vector<8x32xf32>
    %134 = arith.addf %131, %133 : vector<8x32xf32>
    %135 = vector.extract_strided_slice %21 {offsets = [40, 0], sizes = [8, 96], strides = [1, 1]} : vector<64x96xf32> to vector<8x96xf32>
    %cst_31 = arith.constant dense<0.000000e+00> : vector<8x96xf32>
    %136 = tpu.matmul %134, %27, %cst_31 {dimension_numbers = #tpu.dot_dimension_numbers<[1], [0], [0], [1], [0, 0, 1, 1], [], []>} : vector<8x32xf32>, vector<32x96xf32>, vector<8x96xf32> -> vector<8x96xf32>
    %137 = vector.extract_strided_slice %135 {offsets = [0, 0], sizes = [8, 64], strides = [1, 1]} : vector<8x96xf32> to vector<8x64xf32>
    %138 = vector.extract_strided_slice %136 {offsets = [0, 0], sizes = [8, 64], strides = [1, 1]} : vector<8x96xf32> to vector<8x64xf32>
    %139 = arith.addf %137, %138 : vector<8x64xf32>
    %140 = arith.negf %139 : vector<8x64xf32>
    %141 = math.exp %140 : vector<8x64xf32>
    %cst_32 = arith.constant 1.000000e+00 : f32
    %142 = vector.broadcast %cst_32 : f32 to vector<8x64xf32>
    %143 = arith.addf %142, %141 : vector<8x64xf32>
    %144 = arith.divf %142, %143 : vector<8x64xf32>
    %145 = vector.extract_strided_slice %144 {offsets = [0, 0], sizes = [8, 32], strides = [1, 1]} : vector<8x64xf32> to vector<8x32xf32>
    %146 = vector.extract_strided_slice %144 {offsets = [0, 32], sizes = [8, 32], strides = [1, 1]} : vector<8x64xf32> to vector<8x32xf32>
    %147 = vector.extract_strided_slice %135 {offsets = [0, 64], sizes = [8, 32], strides = [1, 1]} : vector<8x96xf32> to vector<8x32xf32>
    %148 = vector.extract_strided_slice %136 {offsets = [0, 64], sizes = [8, 32], strides = [1, 1]} : vector<8x96xf32> to vector<8x32xf32>
    %149 = arith.addf %148, %4 : vector<8x32xf32>
    %150 = arith.mulf %145, %149 : vector<8x32xf32>
    %151 = arith.addf %147, %150 : vector<8x32xf32>
    %152 = math.tanh %151 : vector<8x32xf32>
    %153 = arith.subf %134, %152 : vector<8x32xf32>
    %154 = arith.mulf %146, %153 : vector<8x32xf32>
    %155 = arith.addf %152, %154 : vector<8x32xf32>
    %156 = vector.extract_strided_slice %21 {offsets = [48, 0], sizes = [8, 96], strides = [1, 1]} : vector<64x96xf32> to vector<8x96xf32>
    %cst_33 = arith.constant dense<0.000000e+00> : vector<8x96xf32>
    %157 = tpu.matmul %155, %27, %cst_33 {dimension_numbers = #tpu.dot_dimension_numbers<[1], [0], [0], [1], [0, 0, 1, 1], [], []>} : vector<8x32xf32>, vector<32x96xf32>, vector<8x96xf32> -> vector<8x96xf32>
    %158 = vector.extract_strided_slice %156 {offsets = [0, 0], sizes = [8, 64], strides = [1, 1]} : vector<8x96xf32> to vector<8x64xf32>
    %159 = vector.extract_strided_slice %157 {offsets = [0, 0], sizes = [8, 64], strides = [1, 1]} : vector<8x96xf32> to vector<8x64xf32>
    %160 = arith.addf %158, %159 : vector<8x64xf32>
    %161 = arith.negf %160 : vector<8x64xf32>
    %162 = math.exp %161 : vector<8x64xf32>
    %cst_34 = arith.constant 1.000000e+00 : f32
    %163 = vector.broadcast %cst_34 : f32 to vector<8x64xf32>
    %164 = arith.addf %163, %162 : vector<8x64xf32>
    %165 = arith.divf %163, %164 : vector<8x64xf32>
    %166 = vector.extract_strided_slice %165 {offsets = [0, 0], sizes = [8, 32], strides = [1, 1]} : vector<8x64xf32> to vector<8x32xf32>
    %167 = vector.extract_strided_slice %165 {offsets = [0, 32], sizes = [8, 32], strides = [1, 1]} : vector<8x64xf32> to vector<8x32xf32>
    %168 = vector.extract_strided_slice %156 {offsets = [0, 64], sizes = [8, 32], strides = [1, 1]} : vector<8x96xf32> to vector<8x32xf32>
    %169 = vector.extract_strided_slice %157 {offsets = [0, 64], sizes = [8, 32], strides = [1, 1]} : vector<8x96xf32> to vector<8x32xf32>
    %170 = arith.addf %169, %4 : vector<8x32xf32>
    %171 = arith.mulf %166, %170 : vector<8x32xf32>
    %172 = arith.addf %168, %171 : vector<8x32xf32>
    %173 = math.tanh %172 : vector<8x32xf32>
    %174 = arith.subf %155, %173 : vector<8x32xf32>
    %175 = arith.mulf %167, %174 : vector<8x32xf32>
    %176 = arith.addf %173, %175 : vector<8x32xf32>
    %177 = vector.extract_strided_slice %21 {offsets = [56, 0], sizes = [8, 96], strides = [1, 1]} : vector<64x96xf32> to vector<8x96xf32>
    %cst_35 = arith.constant dense<0.000000e+00> : vector<8x96xf32>
    %178 = tpu.matmul %176, %27, %cst_35 {dimension_numbers = #tpu.dot_dimension_numbers<[1], [0], [0], [1], [0, 0, 1, 1], [], []>} : vector<8x32xf32>, vector<32x96xf32>, vector<8x96xf32> -> vector<8x96xf32>
    %179 = vector.extract_strided_slice %177 {offsets = [0, 0], sizes = [8, 64], strides = [1, 1]} : vector<8x96xf32> to vector<8x64xf32>
    %180 = vector.extract_strided_slice %178 {offsets = [0, 0], sizes = [8, 64], strides = [1, 1]} : vector<8x96xf32> to vector<8x64xf32>
    %181 = arith.addf %179, %180 : vector<8x64xf32>
    %182 = arith.negf %181 : vector<8x64xf32>
    %183 = math.exp %182 : vector<8x64xf32>
    %cst_36 = arith.constant 1.000000e+00 : f32
    %184 = vector.broadcast %cst_36 : f32 to vector<8x64xf32>
    %185 = arith.addf %184, %183 : vector<8x64xf32>
    %186 = arith.divf %184, %185 : vector<8x64xf32>
    %187 = vector.extract_strided_slice %186 {offsets = [0, 0], sizes = [8, 32], strides = [1, 1]} : vector<8x64xf32> to vector<8x32xf32>
    %188 = vector.extract_strided_slice %186 {offsets = [0, 32], sizes = [8, 32], strides = [1, 1]} : vector<8x64xf32> to vector<8x32xf32>
    %189 = vector.extract_strided_slice %177 {offsets = [0, 64], sizes = [8, 32], strides = [1, 1]} : vector<8x96xf32> to vector<8x32xf32>
    %190 = vector.extract_strided_slice %178 {offsets = [0, 64], sizes = [8, 32], strides = [1, 1]} : vector<8x96xf32> to vector<8x32xf32>
    %191 = arith.addf %190, %4 : vector<8x32xf32>
    %192 = arith.mulf %187, %191 : vector<8x32xf32>
    %193 = arith.addf %189, %192 : vector<8x32xf32>
    %194 = math.tanh %193 : vector<8x32xf32>
    %195 = arith.subf %176, %194 : vector<8x32xf32>
    %196 = arith.mulf %188, %195 : vector<8x32xf32>
    %197 = arith.addf %194, %196 : vector<8x32xf32>
    %c0_37 = arith.constant 0 : index
    %c0_38 = arith.constant 0 : index
    %198 = vector.load %arg1[%c0_37, %c0_38] : memref<8x32xf32, #tpu.memory_space<vmem>>, vector<8x32xf32>
    %199 = arith.addf %197, %198 : vector<8x32xf32>
    %200 = vector.shape_cast %1 : vector<1x96xf32> to vector<1x96xf32>
    %201 = vector.broadcast %200 : vector<1x96xf32> to vector<8x96xf32>
    %cst_39 = arith.constant dense<0.000000e+00> : vector<8x96xf32>
    %202 = tpu.matmul %199, %28, %cst_39 {dimension_numbers = #tpu.dot_dimension_numbers<[1], [0], [0], [1], [0, 0, 1, 1], [], []>} : vector<8x32xf32>, vector<32x96xf32>, vector<8x96xf32> -> vector<8x96xf32>
    %203 = vector.extract_strided_slice %201 {offsets = [0, 0], sizes = [8, 64], strides = [1, 1]} : vector<8x96xf32> to vector<8x64xf32>
    %204 = vector.extract_strided_slice %202 {offsets = [0, 0], sizes = [8, 64], strides = [1, 1]} : vector<8x96xf32> to vector<8x64xf32>
    %205 = arith.addf %203, %204 : vector<8x64xf32>
    %206 = arith.negf %205 : vector<8x64xf32>
    %207 = math.exp %206 : vector<8x64xf32>
    %cst_40 = arith.constant 1.000000e+00 : f32
    %208 = vector.broadcast %cst_40 : f32 to vector<8x64xf32>
    %209 = arith.addf %208, %207 : vector<8x64xf32>
    %210 = arith.divf %208, %209 : vector<8x64xf32>
    %211 = vector.extract_strided_slice %210 {offsets = [0, 0], sizes = [8, 32], strides = [1, 1]} : vector<8x64xf32> to vector<8x32xf32>
    %212 = vector.extract_strided_slice %210 {offsets = [0, 32], sizes = [8, 32], strides = [1, 1]} : vector<8x64xf32> to vector<8x32xf32>
    %213 = vector.extract_strided_slice %201 {offsets = [0, 64], sizes = [8, 32], strides = [1, 1]} : vector<8x96xf32> to vector<8x32xf32>
    %214 = vector.extract_strided_slice %202 {offsets = [0, 64], sizes = [8, 32], strides = [1, 1]} : vector<8x96xf32> to vector<8x32xf32>
    %215 = arith.addf %214, %7 : vector<8x32xf32>
    %216 = arith.mulf %211, %215 : vector<8x32xf32>
    %217 = arith.addf %213, %216 : vector<8x32xf32>
    %218 = math.tanh %217 : vector<8x32xf32>
    %219 = arith.subf %199, %218 : vector<8x32xf32>
    %220 = arith.mulf %212, %219 : vector<8x32xf32>
    %221 = arith.addf %218, %220 : vector<8x32xf32>
    %c0_41 = arith.constant 0 : index
    %c0_42 = arith.constant 0 : index
    %222 = vector.load %arg8[%c0_41, %c0_42] : memref<64x32xf32, #tpu.memory_space<vmem>>, vector<8x32xf32>
    tpu.vector_store %arg8[%c0_41, %c0_42], %221 {strides = array<i32>} : memref<64x32xf32, #tpu.memory_space<vmem>>, vector<8x32xf32>,
    %223 = vector.extract_strided_slice %26 {offsets = [0, 0], sizes = [8, 96], strides = [1, 1]} : vector<64x96xf32> to vector<8x96xf32>
    %cst_43 = arith.constant dense<0.000000e+00> : vector<8x96xf32>
    %224 = tpu.matmul %221, %28, %cst_43 {dimension_numbers = #tpu.dot_dimension_numbers<[1], [0], [0], [1], [0, 0, 1, 1], [], []>} : vector<8x32xf32>, vector<32x96xf32>, vector<8x96xf32> -> vector<8x96xf32>
    %225 = vector.extract_strided_slice %223 {offsets = [0, 0], sizes = [8, 64], strides = [1, 1]} : vector<8x96xf32> to vector<8x64xf32>
    %226 = vector.extract_strided_slice %224 {offsets = [0, 0], sizes = [8, 64], strides = [1, 1]} : vector<8x96xf32> to vector<8x64xf32>
    %227 = arith.addf %225, %226 : vector<8x64xf32>
    %228 = arith.negf %227 : vector<8x64xf32>
    %229 = math.exp %228 : vector<8x64xf32>
    %cst_44 = arith.constant 1.000000e+00 : f32
    %230 = vector.broadcast %cst_44 : f32 to vector<8x64xf32>
    %231 = arith.addf %230, %229 : vector<8x64xf32>
    %232 = arith.divf %230, %231 : vector<8x64xf32>
    %233 = vector.extract_strided_slice %232 {offsets = [0, 0], sizes = [8, 32], strides = [1, 1]} : vector<8x64xf32> to vector<8x32xf32>
    %234 = vector.extract_strided_slice %232 {offsets = [0, 32], sizes = [8, 32], strides = [1, 1]} : vector<8x64xf32> to vector<8x32xf32>
    %235 = vector.extract_strided_slice %223 {offsets = [0, 64], sizes = [8, 32], strides = [1, 1]} : vector<8x96xf32> to vector<8x32xf32>
    %236 = vector.extract_strided_slice %224 {offsets = [0, 64], sizes = [8, 32], strides = [1, 1]} : vector<8x96xf32> to vector<8x32xf32>
    %237 = arith.addf %236, %7 : vector<8x32xf32>
    %238 = arith.mulf %233, %237 : vector<8x32xf32>
    %239 = arith.addf %235, %238 : vector<8x32xf32>
    %240 = math.tanh %239 : vector<8x32xf32>
    %241 = arith.subf %221, %240 : vector<8x32xf32>
    %242 = arith.mulf %234, %241 : vector<8x32xf32>
    %243 = arith.addf %240, %242 : vector<8x32xf32>
    %c8 = arith.constant 8 : index
    %c0_45 = arith.constant 0 : index
    %244 = vector.load %arg8[%c8, %c0_45] : memref<64x32xf32, #tpu.memory_space<vmem>>, vector<8x32xf32>
    tpu.vector_store %arg8[%c8, %c0_45], %243 {strides = array<i32>} : memref<64x32xf32, #tpu.memory_space<vmem>>, vector<8x32xf32>,
    %245 = vector.extract_strided_slice %26 {offsets = [8, 0], sizes = [8, 96], strides = [1, 1]} : vector<64x96xf32> to vector<8x96xf32>
    %cst_46 = arith.constant dense<0.000000e+00> : vector<8x96xf32>
    %246 = tpu.matmul %243, %28, %cst_46 {dimension_numbers = #tpu.dot_dimension_numbers<[1], [0], [0], [1], [0, 0, 1, 1], [], []>} : vector<8x32xf32>, vector<32x96xf32>, vector<8x96xf32> -> vector<8x96xf32>
    %247 = vector.extract_strided_slice %245 {offsets = [0, 0], sizes = [8, 64], strides = [1, 1]} : vector<8x96xf32> to vector<8x64xf32>
    %248 = vector.extract_strided_slice %246 {offsets = [0, 0], sizes = [8, 64], strides = [1, 1]} : vector<8x96xf32> to vector<8x64xf32>
    %249 = arith.addf %247, %248 : vector<8x64xf32>
    %250 = arith.negf %249 : vector<8x64xf32>
    %251 = math.exp %250 : vector<8x64xf32>
    %cst_47 = arith.constant 1.000000e+00 : f32
    %252 = vector.broadcast %cst_47 : f32 to vector<8x64xf32>
    %253 = arith.addf %252, %251 : vector<8x64xf32>
    %254 = arith.divf %252, %253 : vector<8x64xf32>
    %255 = vector.extract_strided_slice %254 {offsets = [0, 0], sizes = [8, 32], strides = [1, 1]} : vector<8x64xf32> to vector<8x32xf32>
    %256 = vector.extract_strided_slice %254 {offsets = [0, 32], sizes = [8, 32], strides = [1, 1]} : vector<8x64xf32> to vector<8x32xf32>
    %257 = vector.extract_strided_slice %245 {offsets = [0, 64], sizes = [8, 32], strides = [1, 1]} : vector<8x96xf32> to vector<8x32xf32>
    %258 = vector.extract_strided_slice %246 {offsets = [0, 64], sizes = [8, 32], strides = [1, 1]} : vector<8x96xf32> to vector<8x32xf32>
    %259 = arith.addf %258, %7 : vector<8x32xf32>
    %260 = arith.mulf %255, %259 : vector<8x32xf32>
    %261 = arith.addf %257, %260 : vector<8x32xf32>
    %262 = math.tanh %261 : vector<8x32xf32>
    %263 = arith.subf %243, %262 : vector<8x32xf32>
    %264 = arith.mulf %256, %263 : vector<8x32xf32>
    %265 = arith.addf %262, %264 : vector<8x32xf32>
    %c16 = arith.constant 16 : index
    %c0_48 = arith.constant 0 : index
    %266 = vector.load %arg8[%c16, %c0_48] : memref<64x32xf32, #tpu.memory_space<vmem>>, vector<8x32xf32>
    tpu.vector_store %arg8[%c16, %c0_48], %265 {strides = array<i32>} : memref<64x32xf32, #tpu.memory_space<vmem>>, vector<8x32xf32>,
    %267 = vector.extract_strided_slice %26 {offsets = [16, 0], sizes = [8, 96], strides = [1, 1]} : vector<64x96xf32> to vector<8x96xf32>
    %cst_49 = arith.constant dense<0.000000e+00> : vector<8x96xf32>
    %268 = tpu.matmul %265, %28, %cst_49 {dimension_numbers = #tpu.dot_dimension_numbers<[1], [0], [0], [1], [0, 0, 1, 1], [], []>} : vector<8x32xf32>, vector<32x96xf32>, vector<8x96xf32> -> vector<8x96xf32>
    %269 = vector.extract_strided_slice %267 {offsets = [0, 0], sizes = [8, 64], strides = [1, 1]} : vector<8x96xf32> to vector<8x64xf32>
    %270 = vector.extract_strided_slice %268 {offsets = [0, 0], sizes = [8, 64], strides = [1, 1]} : vector<8x96xf32> to vector<8x64xf32>
    %271 = arith.addf %269, %270 : vector<8x64xf32>
    %272 = arith.negf %271 : vector<8x64xf32>
    %273 = math.exp %272 : vector<8x64xf32>
    %cst_50 = arith.constant 1.000000e+00 : f32
    %274 = vector.broadcast %cst_50 : f32 to vector<8x64xf32>
    %275 = arith.addf %274, %273 : vector<8x64xf32>
    %276 = arith.divf %274, %275 : vector<8x64xf32>
    %277 = vector.extract_strided_slice %276 {offsets = [0, 0], sizes = [8, 32], strides = [1, 1]} : vector<8x64xf32> to vector<8x32xf32>
    %278 = vector.extract_strided_slice %276 {offsets = [0, 32], sizes = [8, 32], strides = [1, 1]} : vector<8x64xf32> to vector<8x32xf32>
    %279 = vector.extract_strided_slice %267 {offsets = [0, 64], sizes = [8, 32], strides = [1, 1]} : vector<8x96xf32> to vector<8x32xf32>
    %280 = vector.extract_strided_slice %268 {offsets = [0, 64], sizes = [8, 32], strides = [1, 1]} : vector<8x96xf32> to vector<8x32xf32>
    %281 = arith.addf %280, %7 : vector<8x32xf32>
    %282 = arith.mulf %277, %281 : vector<8x32xf32>
    %283 = arith.addf %279, %282 : vector<8x32xf32>
    %284 = math.tanh %283 : vector<8x32xf32>
    %285 = arith.subf %265, %284 : vector<8x32xf32>
    %286 = arith.mulf %278, %285 : vector<8x32xf32>
    %287 = arith.addf %284, %286 : vector<8x32xf32>
    %c24 = arith.constant 24 : index
    %c0_51 = arith.constant 0 : index
    %288 = vector.load %arg8[%c24, %c0_51] : memref<64x32xf32, #tpu.memory_space<vmem>>, vector<8x32xf32>
    tpu.vector_store %arg8[%c24, %c0_51], %287 {strides = array<i32>} : memref<64x32xf32, #tpu.memory_space<vmem>>, vector<8x32xf32>,
    %289 = vector.extract_strided_slice %26 {offsets = [24, 0], sizes = [8, 96], strides = [1, 1]} : vector<64x96xf32> to vector<8x96xf32>
    %cst_52 = arith.constant dense<0.000000e+00> : vector<8x96xf32>
    %290 = tpu.matmul %287, %28, %cst_52 {dimension_numbers = #tpu.dot_dimension_numbers<[1], [0], [0], [1], [0, 0, 1, 1], [], []>} : vector<8x32xf32>, vector<32x96xf32>, vector<8x96xf32> -> vector<8x96xf32>
    %291 = vector.extract_strided_slice %289 {offsets = [0, 0], sizes = [8, 64], strides = [1, 1]} : vector<8x96xf32> to vector<8x64xf32>
    %292 = vector.extract_strided_slice %290 {offsets = [0, 0], sizes = [8, 64], strides = [1, 1]} : vector<8x96xf32> to vector<8x64xf32>
    %293 = arith.addf %291, %292 : vector<8x64xf32>
    %294 = arith.negf %293 : vector<8x64xf32>
    %295 = math.exp %294 : vector<8x64xf32>
    %cst_53 = arith.constant 1.000000e+00 : f32
    %296 = vector.broadcast %cst_53 : f32 to vector<8x64xf32>
    %297 = arith.addf %296, %295 : vector<8x64xf32>
    %298 = arith.divf %296, %297 : vector<8x64xf32>
    %299 = vector.extract_strided_slice %298 {offsets = [0, 0], sizes = [8, 32], strides = [1, 1]} : vector<8x64xf32> to vector<8x32xf32>
    %300 = vector.extract_strided_slice %298 {offsets = [0, 32], sizes = [8, 32], strides = [1, 1]} : vector<8x64xf32> to vector<8x32xf32>
    %301 = vector.extract_strided_slice %289 {offsets = [0, 64], sizes = [8, 32], strides = [1, 1]} : vector<8x96xf32> to vector<8x32xf32>
    %302 = vector.extract_strided_slice %290 {offsets = [0, 64], sizes = [8, 32], strides = [1, 1]} : vector<8x96xf32> to vector<8x32xf32>
    %303 = arith.addf %302, %7 : vector<8x32xf32>
    %304 = arith.mulf %299, %303 : vector<8x32xf32>
    %305 = arith.addf %301, %304 : vector<8x32xf32>
    %306 = math.tanh %305 : vector<8x32xf32>
    %307 = arith.subf %287, %306 : vector<8x32xf32>
    %308 = arith.mulf %300, %307 : vector<8x32xf32>
    %309 = arith.addf %306, %308 : vector<8x32xf32>
    %c32_54 = arith.constant 32 : index
    %c0_55 = arith.constant 0 : index
    %310 = vector.load %arg8[%c32_54, %c0_55] : memref<64x32xf32, #tpu.memory_space<vmem>>, vector<8x32xf32>
    tpu.vector_store %arg8[%c32_54, %c0_55], %309 {strides = array<i32>} : memref<64x32xf32, #tpu.memory_space<vmem>>, vector<8x32xf32>,
    %311 = vector.extract_strided_slice %26 {offsets = [32, 0], sizes = [8, 96], strides = [1, 1]} : vector<64x96xf32> to vector<8x96xf32>
    %cst_56 = arith.constant dense<0.000000e+00> : vector<8x96xf32>
    %312 = tpu.matmul %309, %28, %cst_56 {dimension_numbers = #tpu.dot_dimension_numbers<[1], [0], [0], [1], [0, 0, 1, 1], [], []>} : vector<8x32xf32>, vector<32x96xf32>, vector<8x96xf32> -> vector<8x96xf32>
    %313 = vector.extract_strided_slice %311 {offsets = [0, 0], sizes = [8, 64], strides = [1, 1]} : vector<8x96xf32> to vector<8x64xf32>
    %314 = vector.extract_strided_slice %312 {offsets = [0, 0], sizes = [8, 64], strides = [1, 1]} : vector<8x96xf32> to vector<8x64xf32>
    %315 = arith.addf %313, %314 : vector<8x64xf32>
    %316 = arith.negf %315 : vector<8x64xf32>
    %317 = math.exp %316 : vector<8x64xf32>
    %cst_57 = arith.constant 1.000000e+00 : f32
    %318 = vector.broadcast %cst_57 : f32 to vector<8x64xf32>
    %319 = arith.addf %318, %317 : vector<8x64xf32>
    %320 = arith.divf %318, %319 : vector<8x64xf32>
    %321 = vector.extract_strided_slice %320 {offsets = [0, 0], sizes = [8, 32], strides = [1, 1]} : vector<8x64xf32> to vector<8x32xf32>
    %322 = vector.extract_strided_slice %320 {offsets = [0, 32], sizes = [8, 32], strides = [1, 1]} : vector<8x64xf32> to vector<8x32xf32>
    %323 = vector.extract_strided_slice %311 {offsets = [0, 64], sizes = [8, 32], strides = [1, 1]} : vector<8x96xf32> to vector<8x32xf32>
    %324 = vector.extract_strided_slice %312 {offsets = [0, 64], sizes = [8, 32], strides = [1, 1]} : vector<8x96xf32> to vector<8x32xf32>
    %325 = arith.addf %324, %7 : vector<8x32xf32>
    %326 = arith.mulf %321, %325 : vector<8x32xf32>
    %327 = arith.addf %323, %326 : vector<8x32xf32>
    %328 = math.tanh %327 : vector<8x32xf32>
    %329 = arith.subf %309, %328 : vector<8x32xf32>
    %330 = arith.mulf %322, %329 : vector<8x32xf32>
    %331 = arith.addf %328, %330 : vector<8x32xf32>
    %c40 = arith.constant 40 : index
    %c0_58 = arith.constant 0 : index
    %332 = vector.load %arg8[%c40, %c0_58] : memref<64x32xf32, #tpu.memory_space<vmem>>, vector<8x32xf32>
    tpu.vector_store %arg8[%c40, %c0_58], %331 {strides = array<i32>} : memref<64x32xf32, #tpu.memory_space<vmem>>, vector<8x32xf32>,
    %333 = vector.extract_strided_slice %26 {offsets = [40, 0], sizes = [8, 96], strides = [1, 1]} : vector<64x96xf32> to vector<8x96xf32>
    %cst_59 = arith.constant dense<0.000000e+00> : vector<8x96xf32>
    %334 = tpu.matmul %331, %28, %cst_59 {dimension_numbers = #tpu.dot_dimension_numbers<[1], [0], [0], [1], [0, 0, 1, 1], [], []>} : vector<8x32xf32>, vector<32x96xf32>, vector<8x96xf32> -> vector<8x96xf32>
    %335 = vector.extract_strided_slice %333 {offsets = [0, 0], sizes = [8, 64], strides = [1, 1]} : vector<8x96xf32> to vector<8x64xf32>
    %336 = vector.extract_strided_slice %334 {offsets = [0, 0], sizes = [8, 64], strides = [1, 1]} : vector<8x96xf32> to vector<8x64xf32>
    %337 = arith.addf %335, %336 : vector<8x64xf32>
    %338 = arith.negf %337 : vector<8x64xf32>
    %339 = math.exp %338 : vector<8x64xf32>
    %cst_60 = arith.constant 1.000000e+00 : f32
    %340 = vector.broadcast %cst_60 : f32 to vector<8x64xf32>
    %341 = arith.addf %340, %339 : vector<8x64xf32>
    %342 = arith.divf %340, %341 : vector<8x64xf32>
    %343 = vector.extract_strided_slice %342 {offsets = [0, 0], sizes = [8, 32], strides = [1, 1]} : vector<8x64xf32> to vector<8x32xf32>
    %344 = vector.extract_strided_slice %342 {offsets = [0, 32], sizes = [8, 32], strides = [1, 1]} : vector<8x64xf32> to vector<8x32xf32>
    %345 = vector.extract_strided_slice %333 {offsets = [0, 64], sizes = [8, 32], strides = [1, 1]} : vector<8x96xf32> to vector<8x32xf32>
    %346 = vector.extract_strided_slice %334 {offsets = [0, 64], sizes = [8, 32], strides = [1, 1]} : vector<8x96xf32> to vector<8x32xf32>
    %347 = arith.addf %346, %7 : vector<8x32xf32>
    %348 = arith.mulf %343, %347 : vector<8x32xf32>
    %349 = arith.addf %345, %348 : vector<8x32xf32>
    %350 = math.tanh %349 : vector<8x32xf32>
    %351 = arith.subf %331, %350 : vector<8x32xf32>
    %352 = arith.mulf %344, %351 : vector<8x32xf32>
    %353 = arith.addf %350, %352 : vector<8x32xf32>
    %c48 = arith.constant 48 : index
    %c0_61 = arith.constant 0 : index
    %354 = vector.load %arg8[%c48, %c0_61] : memref<64x32xf32, #tpu.memory_space<vmem>>, vector<8x32xf32>
    tpu.vector_store %arg8[%c48, %c0_61], %353 {strides = array<i32>} : memref<64x32xf32, #tpu.memory_space<vmem>>, vector<8x32xf32>,
    %355 = vector.extract_strided_slice %26 {offsets = [48, 0], sizes = [8, 96], strides = [1, 1]} : vector<64x96xf32> to vector<8x96xf32>
    %cst_62 = arith.constant dense<0.000000e+00> : vector<8x96xf32>
    %356 = tpu.matmul %353, %28, %cst_62 {dimension_numbers = #tpu.dot_dimension_numbers<[1], [0], [0], [1], [0, 0, 1, 1], [], []>} : vector<8x32xf32>, vector<32x96xf32>, vector<8x96xf32> -> vector<8x96xf32>
    %357 = vector.extract_strided_slice %355 {offsets = [0, 0], sizes = [8, 64], strides = [1, 1]} : vector<8x96xf32> to vector<8x64xf32>
    %358 = vector.extract_strided_slice %356 {offsets = [0, 0], sizes = [8, 64], strides = [1, 1]} : vector<8x96xf32> to vector<8x64xf32>
    %359 = arith.addf %357, %358 : vector<8x64xf32>
    %360 = arith.negf %359 : vector<8x64xf32>
    %361 = math.exp %360 : vector<8x64xf32>
    %cst_63 = arith.constant 1.000000e+00 : f32
    %362 = vector.broadcast %cst_63 : f32 to vector<8x64xf32>
    %363 = arith.addf %362, %361 : vector<8x64xf32>
    %364 = arith.divf %362, %363 : vector<8x64xf32>
    %365 = vector.extract_strided_slice %364 {offsets = [0, 0], sizes = [8, 32], strides = [1, 1]} : vector<8x64xf32> to vector<8x32xf32>
    %366 = vector.extract_strided_slice %364 {offsets = [0, 32], sizes = [8, 32], strides = [1, 1]} : vector<8x64xf32> to vector<8x32xf32>
    %367 = vector.extract_strided_slice %355 {offsets = [0, 64], sizes = [8, 32], strides = [1, 1]} : vector<8x96xf32> to vector<8x32xf32>
    %368 = vector.extract_strided_slice %356 {offsets = [0, 64], sizes = [8, 32], strides = [1, 1]} : vector<8x96xf32> to vector<8x32xf32>
    %369 = arith.addf %368, %7 : vector<8x32xf32>
    %370 = arith.mulf %365, %369 : vector<8x32xf32>
    %371 = arith.addf %367, %370 : vector<8x32xf32>
    %372 = math.tanh %371 : vector<8x32xf32>
    %373 = arith.subf %353, %372 : vector<8x32xf32>
    %374 = arith.mulf %366, %373 : vector<8x32xf32>
    %375 = arith.addf %372, %374 : vector<8x32xf32>
    %c56 = arith.constant 56 : index
    %c0_64 = arith.constant 0 : index
    %376 = vector.load %arg8[%c56, %c0_64] : memref<64x32xf32, #tpu.memory_space<vmem>>, vector<8x32xf32>
    tpu.vector_store %arg8[%c56, %c0_64], %375 {strides = array<i32>} : memref<64x32xf32, #tpu.memory_space<vmem>>, vector<8x32xf32>,
    %c0_65 = arith.constant 0 : index
    %c0_66 = arith.constant 0 : index
    %377 = vector.load %arg8[%c0_65, %c0_66] : memref<64x32xf32, #tpu.memory_space<vmem>>, vector<64x32xf32>
    %c0_67 = arith.constant 0 : index
    %c0_68 = arith.constant 0 : index
    %378 = vector.load %arg5[%c0_67, %c0_68] : memref<32x16xf32, #tpu.memory_space<vmem>>, vector<32x16xf32>
    %cst_69 = arith.constant dense<0.000000e+00> : vector<64x16xf32>
    %379 = tpu.matmul %377, %378, %cst_69 {dimension_numbers = #tpu.dot_dimension_numbers<[1], [0], [0], [1], [0, 0, 1, 1], [], []>} : vector<64x32xf32>, vector<32x16xf32>, vector<64x16xf32> -> vector<64x16xf32>
    %380 = vector.broadcast %9 : vector<1x16xf32> to vector<64x16xf32>
    %381 = arith.addf %379, %380 : vector<64x16xf32>
    %c0_70 = arith.constant 0 : index
    %c0_71 = arith.constant 0 : index
    %382 = vector.load %arg7[%c0_70, %c0_71] : memref<64x16xf32, #tpu.memory_space<vmem>>, vector<64x16xf32>
    tpu.vector_store %arg7[%c0_70, %c0_71], %381 {strides = array<i32>} : memref<64x16xf32, #tpu.memory_space<vmem>>, vector<64x16xf32>,
    return
  }
}

</mosaic_0001>

<bundles_post_ra>
// kernel: netg_forward.1
= control target key start
LH: loop header
LB: loop body
LE: loop exit
PB: predicated region body
PF: predicated region fallthrough
CT: control target
= control target key end

     0   :  { %vm62_vm0 = vcmask 130048   ;;  %v3002_v6 = vmov 0.0   ;;  %vm3003_vm1 = vmmov 0   ;;  %s3004_s29 = smov 64   ;;  %vm280_vm2 = vcmask 261120   ;;  %s3005_s17 = smov 96   ;;  %s3649_s2 = inlined_call_operand.vmem [shape: f32[16,32], index: 2, kind: input, shape index: {}]   ;;  %s3650_s0 = inlined_call_operand.vmem [shape: f32[128,16], index: 0, kind: input, shape index: {}]   ;;  %s3651_s4 = inlined_call_operand.vmem [shape: f32[64,96], index: 4, kind: input, shape index: {}]   ;;  %s3652_s3 = inlined_call_operand.vmem [shape: f32[64,96], index: 3, kind: input, shape index: {}]   ;;  %s3653_s6 = inlined_call_operand.vmem [shape: f32[8,96], index: 6, kind: input, shape index: {}]   ;;  %s3654_s1 = inlined_call_operand.vmem [shape: f32[8,32], index: 1, kind: input, shape index: {}]   ;;  %s3655_s5 = inlined_call_operand.vmem [shape: f32[32,16], index: 5, kind: input, shape index: {}]   ;;  %s3656_s7 = inlined_call_operand.vmem [shape: f32[64,16], index: 7, kind: output, shape index: {}]  }
   0x1   :  { %v57_v0 = vld [vmem:[%s3649_s2 + $0x8] sm:$0xff]  ;;  %v56_v1 = vld [vmem:[%s3649_s2] sm:$0xff]  ;;  %v42_v4 = vld [vmem:[%s3650_s0 + $0x10] sm:$0xff]  ;;  %s3006_s18 = smov 32  }
   0x2   :  { %v40_v2 = vld [vmem:[%s3650_s0] sm:$0xff]  ;;  %2633 = vmatprep.subr.mxu0 %v57_v0  ;;  %v41_v3 = vld [vmem:[%s3650_s0 + $0x8] sm:$0xff]  ;;  %2897 = vmatprep.subr.mxu1 %v57_v0  ;;  %v3066_v5 = vld [vmem:[%s3651_s4 + $0x18] sm:$0xff] }
   0x3   :  { %2637 = vmatprep.mubr.msk.f32.mxu0 %vm62_vm0, %v40_v2  ;;  %2634 = vmatpush3.msra.mxu0 %v57_v0  ;;  %v3073_v7 = vld [vmem:[%s3651_s4 + $0x10] sm:$0xff]  ;;  %v43_v8 = vld [vmem:[%s3650_s0 + $0x18] sm:$0xff]  ;;  %v52_v9 = vld [vmem:[%s3650_s0 + $0x60] sm:$0xff] }
   0x4   :  { %2635 = vmatprep.subr.mxu0 %v56_v1  ;;  %2899 = vmatpush3.msra.mxu1 %v57_v0  ;;  %v44_v10 = vld [vmem:[%s3650_s0 + $0x20] sm:$0xff]  ;;  %v3090_v11 = vld [vmem:[%s3651_s4 + $0x8] sm:$0xff]  ;;  %v54_v14 = vld [vmem:[%s3650_s0 + $0x70] sm:$0xff] }
   0x5   :  { %2636 = vmatpush3.msra.mxu0 %v56_v1  ;;  %2898 = vmatprep.subr.mxu1 %v56_v1  ;;  %v53_v12 = vld [vmem:[%s3650_s0 + $0x68] sm:$0xff]  ;;  %v3102_v13 = vld [vmem:[%s3651_s4] sm:$0xff]  ;;  %v275_v16 = vld [vmem:[%s3652_s3 + $0x18] sm:$0xff] }
   0x6   :  { %2638 = vmatmul.mubr.msk.f32.vlgmr.msra.gmra.mxu0 %vm62_vm0, %v41_v3  ;;  %2701 = vmatprep.subr.mxu0 %v3002_v6  ;;  %v45_v15 = vld [vmem:[%s3650_s0 + $0x28] sm:$0xff]  ;;  %v46_v17 = vld [vmem:[%s3650_s0 + $0x30] sm:$0xff]  ;;  %v55_v18 = vld [vmem:[%s3650_s0 + $0x78] sm:$0xff] }
   0x7   :  { %2640 = vmatprep.mubr.msk.f32.mxu0 %vm62_vm0, %v42_v4  ;;  %2702 = vmatpush3.msra.mxu0 %v3066_v5  ;;  %v47_v19 = vld [vmem:[%s3650_s0 + $0x38] sm:$0xff]  ;;  %v48_v20 = vld [vmem:[%s3650_s0 + $0x40] sm:$0xff]  ;;  %v49_v21 = vld [vmem:[%s3650_s0 + $0x48] sm:$0xff] }
   0x8   :  { %2703 = vmatprep.subr.mxu0 %v3002_v6  ;;  %2900 = vmatpush3.msra.mxu1 %v56_v1  ;;  %v50_v22 = vld [vmem:[%s3650_s0 + $0x50] sm:$0xff]  ;;  %v51_v23 = vld [vmem:[%s3650_s0 + $0x58] sm:$0xff]  ;;  %v273_v25 = vld [vmem:[%s3652_s3 + $0x8] sm:$0xff] }
   0x9   :  { %2704 = vmatpush3.msra.mxu0 %v3073_v7  ;;  %2655 = vmatprep.mubr.msk.f32.mxu1 %vm62_vm0, %v52_v9  ;;  %v274_v24 = vld [vmem:[%s3652_s3 + $0x10] sm:$0xff]  ;;  %v272_v26 = vld [vmem:[%s3652_s3] sm:$0xff]  ;;  %v413_v28 = vld [vmem:[%s3652_s3 + $0x38] sm:$0xff] }
   0xa   :  { %2641 = vmatmul.mubr.msk.f32.gmra.mxu0 %vm62_vm0, %v43_v8  ;;  %2705 = vmatprep.subr.mxu0 %v3002_v6  ;;  %v2422_v27 = vld [vmem:[%s3653_s6 + $0x2] ss:$0 sm:$0xff]  ;;  %v3181_v29 = vld [vmem:[%s3653_s6 + $0x4] ss:$0 sm:$0xff]  ;;  %v412_v40 = vld [vmem:[%s3652_s3 + $0x30] sm:$0xff] }
   0xb   :  { %2643 = vmatprep.mubr.msk.f32.mxu0 %vm62_vm0, %v44_v10  ;;  %2706 = vmatpush3.msra.mxu0 %v3090_v11  ;;  %v411_v45 = vld [vmem:[%s3652_s3 + $0x28] sm:$0xff]  ;;  %v410_v49 = vld [vmem:[%s3652_s3 + $0x20] sm:$0xff] }
   0xc   :  { %2707 = vmatprep.subr.mxu0 %v3002_v6  ;;  %2656 = vmatmul.mubr.msk.f32.vlgmr.msra.gmra.mxu1 %vm62_vm0, %v53_v12 }
   0xd   :  { %2708 = vmatpush3.msra.mxu0 %v3102_v13  ;;  %2658 = vmatprep.mubr.msk.f32.mxu1 %vm62_vm0, %v54_v14 }
   0xe   :  { %2644 = vmatmul.mubr.msk.f32.gmra.mxu0 %vm62_vm0, %v45_v15  ;;  %2661 = vmatprep.subr.mxu1 %v275_v16 }
   0xf   :  { %2646 = vmatprep.mubr.msk.f32.mxu0 %vm62_vm0, %v46_v17  ;;  %2662 = vmatpush3.msra.mxu1 %v275_v16 }
  0x10   :  { %2659 = vmatmul.mubr.msk.f32.gmra.mxu1 %vm62_vm0, %v55_v18  ;;  %2723 = vmatprep.subr.mxu0 %v3002_v6 }
  0x11   :  { %2663 = vmatprep.subr.mxu1 %v274_v24  ;;  %635 = vrot.lane.b32.xlu0 %v2422_v27, %s3004_s29 }
  0x12   :  { %2647 = vmatmul.mubr.msk.f32.gmra.mxu0 %vm62_vm0, %v47_v19  ;;  %2664 = vmatpush3.msra.mxu1 %v274_v24 }
  0x13   :  { %2649 = vmatprep.mubr.msk.f32.mxu0 %vm62_vm0, %v48_v20  ;;  %2665 = vmatprep.subr.mxu1 %v273_v25 }
  0x14   :  { %2666 = vmatpush3.msra.mxu1 %v273_v25 }
  0x15   :  { %2667 = vmatprep.subr.mxu1 %v272_v26 }
  0x16   :  { %2650 = vmatmul.mubr.msk.f32.gmra.mxu0 %vm62_vm0, %v49_v21  ;;  %2668 = vmatpush3.msra.mxu1 %v272_v26  ;;  %v2441_v26 = vld [vmem:[%s3653_s6] ss:$0 sm:$0xff] }
  0x17   :  { %2652 = vmatprep.mubr.msk.f32.mxu0 %vm62_vm0, %v50_v22  ;;  %2681 = vmatprep.subr.mxu1 %v413_v28 }
  0x1a   :  { %2653 = vmatmul.mubr.msk.f32.gmra.mxu0 %vm62_vm0, %v51_v23 }
  0x1b   :  { %2709 = vmatprep.mubr.msk.f32.mxu0 %vm3003_vm1, %v3002_v6 }
  0x1e   :  { %2710 = vmatmul.mubr.f32.vlgmr.msra.gmra.mxu0 %v3002_v6 }
  0x1f   :  { %2724 = vmatpush3.msra.mxu0 %v3066_v5  ;;  %2731 = vmatprep.mubr.msk.f32.mxu0 %vm3003_vm1, %v3002_v6 }
  0x20   :  { %2725 = vmatprep.subr.mxu0 %v3002_v6 }
  0x21   :  { %2726 = vmatpush3.msra.mxu0 %v3073_v7 }
  0x22   :  { %2727 = vmatprep.subr.mxu0 %v3002_v6 }
  0x23   :  { %2728 = vmatpush3.msra.mxu0 %v3090_v11 }
  0x24   :  { %2729 = vmatprep.subr.mxu0 %v3002_v6 }
  0x25   :  { %2730 = vmatpush3.msra.mxu0 %v3102_v13 }
  0x26   :  { %2745 = vmatprep.subr.mxu0 %v3002_v6 }
  0x83   :  { %v3212_v4 = vpop.permute.xlu0 %635 }
  0xc6   :  { %v2639_v30 = vpop.f32.mrf.mxu0 }
  0xc7   :  { %v183_v31 = vadd.f32 %v2639_v30, %v3181_v29 }
  0xc8   :  { %v177_v32 = vpop.f32.mrf.mxu0 }
  0xc9   :  { %v178_v33 = vadd.f32 %v3181_v29, %v177_v32  ;;  %v257_v37 = vmax.f32 %v183_v31, 0.0 }
  0xca   :  { %v2642_v34 = vpop.f32.mrf.mxu0 }
  0xcb   :  { %v256_v35 = vmax.f32 %v178_v33, 0.0  ;;  %v193_v36 = vadd.f32 %v2642_v34, %v3181_v29 }
  0xcc   :  { %v187_v38 = vpop.f32.mrf.mxu0  ;;  %v2657_v47 = vpop.f32.mrf.mxu1 }
  0xcd   :  { %2669 = vmatprep.mubr.msk.f32.mxu1 %vm280_vm2, %v256_v35  ;;  %v188_v39 = vadd.f32 %v3181_v29, %v187_v38  ;;  %v259_v41 = vmax.f32 %v193_v36, 0.0  ;;  %v243_v16 = vadd.f32 %v2657_v47, %v3181_v29 }
  0xce   :  { %2670 = vmatmul.mubr.msk.f32.vlgmr.msra.gmra.mxu1 %vm280_vm2, %v257_v37  ;;  %v2645_v42 = vpop.f32.mrf.mxu0  ;;  %v237_v55 = vpop.f32.mrf.mxu1 }
  0xcf   :  { %v258_v43 = vmax.f32 %v188_v39, 0.0  ;;  %v203_v44 = vadd.f32 %v2645_v42, %v3181_v29  ;;  %2682 = vmatpush3.msra.mxu1 %v413_v28  ;;  %v238_v8 = vadd.f32 %v3181_v29, %v237_v55  ;;  %v269_v22 = vmax.f32 %v243_v16, 0.0 }
  0xd0   :  { %v197_v46 = vpop.f32.mrf.mxu0  ;;  %2683 = vmatprep.subr.mxu1 %v412_v40  ;;  %v2660_v62 = vpop.f32.mrf.mxu1 }
  0xd1   :  { %v198_v48 = vadd.f32 %v3181_v29, %v197_v46  ;;  %2672 = vmatprep.mubr.msk.f32.mxu1 %vm280_vm2, %v258_v43  ;;  %2684 = vmatpush3.msra.mxu1 %v412_v40  ;;  %v261_v50 = vmax.f32 %v203_v44, 0.0  ;;  %v268_v19 = vmax.f32 %v238_v8, 0.0  ;;  %v253_v23 = vadd.f32 %v2660_v62, %v3181_v29 }
  0xd2   :  { %v2648_v51 = vpop.f32.mrf.mxu0  ;;  %2673 = vmatmul.mubr.msk.f32.gmra.mxu1 %vm280_vm2, %v259_v41  ;;  %2685 = vmatprep.subr.mxu1 %v411_v45  ;;  %v247_v10 = vpop.f32.mrf.mxu1 }
  0xd3   :  { %v260_v52 = vmax.f32 %v198_v48, 0.0  ;;  %v213_v53 = vadd.f32 %v2648_v51, %v3181_v29  ;;  %2686 = vmatpush3.msra.mxu1 %v411_v45  ;;  %v248_v20 = vadd.f32 %v3181_v29, %v247_v10  ;;  %v271_v25 = vmax.f32 %v253_v23, 0.0 }
  0xd4   :  { %v207_v54 = vpop.f32.mrf.mxu0  ;;  %2687 = vmatprep.subr.mxu1 %v410_v49 }
  0xd5   :  { %v208_v56 = vadd.f32 %v3181_v29, %v207_v54  ;;  %2675 = vmatprep.mubr.msk.f32.mxu1 %vm280_vm2, %v260_v52  ;;  %2688 = vmatpush3.msra.mxu1 %v410_v49  ;;  %v263_v57 = vmax.f32 %v213_v53, 0.0  ;;  %v270_v24 = vmax.f32 %v248_v20, 0.0 }
  0xd6   :  { %v2651_v58 = vpop.f32.mrf.mxu0  ;;  %2676 = vmatmul.mubr.msk.f32.gmra.mxu1 %vm280_vm2, %v261_v50  ;;  %2712 = vmatprep.subr.mxu1 %v3002_v6 }
  0xd7   :  { %v262_v59 = vmax.f32 %v208_v56, 0.0  ;;  %v223_v60 = vadd.f32 %v2651_v58, %v3181_v29 }
  0xd8   :  { %v217_v61 = vpop.f32.mrf.mxu0 }
  0xd9   :  { %v218_v63 = vadd.f32 %v3181_v29, %v217_v61  ;;  %2678 = vmatprep.mubr.msk.f32.mxu1 %vm280_vm2, %v262_v59  ;;  %v265_v0 = vmax.f32 %v223_v60, 0.0 }
  0xda   :  { %v2654_v1 = vpop.f32.mrf.mxu0  ;;  %2679 = vmatmul.mubr.msk.f32.gmra.mxu1 %vm280_vm2, %v263_v57 }
  0xdb   :  { %v264_v2 = vmax.f32 %v218_v63, 0.0  ;;  %v233_v3 = vadd.f32 %v2654_v1, %v3181_v29 }
  0xdc   :  { %v227_v9 = vpop.f32.mrf.mxu0 }
  0xdd   :  { %v228_v12 = vadd.f32 %v3181_v29, %v227_v9  ;;  %2689 = vmatprep.mubr.msk.f32.mxu1 %vm280_vm2, %v264_v2  ;;  %v267_v14 = vmax.f32 %v233_v3, 0.0 }
  0xde   :  { %2690 = vmatmul.mubr.msk.f32.vlgmr.msra.gmra.mxu1 %vm280_vm2, %v265_v0  ;;  %v623_v15 = vpop.f32.mrf.mxu0 }
  0xdf   :  { %v266_v17 = vmax.f32 %v228_v12, 0.0  ;;  %v638_v18 = vadd.f32 %v3212_v4, %v623_v15  ;;  %2713 = vmatpush3.msra.mxu1 %v3066_v5 }
  0xe0   :  { %v2711_v21 = vpop.f32.mrf.mxu0  ;;  %2714 = vmatprep.subr.mxu1 %v3002_v6 }
  0xe1   :  { %2692 = vmatprep.mubr.msk.f32.mxu1 %vm280_vm2, %v266_v17  ;;  %640 = vrot.lane.b32.xlu0 %v638_v18, %s3004_s29 }
  0xe2   :  { %2693 = vmatmul.mubr.msk.f32.gmra.mxu1 %vm280_vm2, %v267_v14 }
  0xe3   :  { %2695 = vmatprep.mubr.msk.f32.mxu1 %vm280_vm2, %v268_v19  ;;  %2715 = vmatpush3.msra.mxu1 %v3073_v7 }
  0xe4   :  { %2716 = vmatprep.subr.mxu1 %v3002_v6 }
  0xe5   :  { %2717 = vmatpush3.msra.mxu1 %v3090_v11 }
  0xe6   :  { %2696 = vmatmul.mubr.msk.f32.gmra.mxu1 %vm280_vm2, %v269_v22  ;;  %2718 = vmatprep.subr.mxu1 %v3002_v6 }
  0xe7   :  { %2698 = vmatprep.mubr.msk.f32.mxu1 %vm280_vm2, %v270_v24  ;;  %2719 = vmatpush3.msra.mxu1 %v3102_v13 }
  0xe8   :  { %2734 = vmatprep.subr.mxu1 %v3002_v6 }
  0xea   :  { %2699 = vmatmul.mubr.msk.f32.gmra.mxu1 %vm280_vm2, %v271_v25 }
  0xeb   :  { %2720 = vmatprep.mubr.msk.f32.mxu1 %vm3003_vm1, %v3002_v6 }
 0x153   :  { %v641_v48 = vpop.permute.xlu0 %640 }
 0x18e   :  { %v2671_v27 = vpop.f32.mrf.mxu1 }
 0x18f   :  { %v3242_v28 = vadd.f32 %v2671_v27, %v2441_v26 }
 0x190   :  { %v371_v29 = vpop.f32.mrf.mxu1 }
 0x191   :  { %v372_v30 = vadd.f32 %v2441_v26, %v371_v29 }
 0x192   :  { %v2674_v31 = vpop.f32.mrf.mxu1 }
 0x193   :  { %v627_v32 = vadd.f32 %v623_v15, %v372_v30  ;;  %v3244_v33 = vadd.f32 %v2674_v31, %v2441_v26 }
 0x194   :  { %v381_v34 = vpop.f32.mrf.mxu1 }
 0x195   :  { %v2459_v35 = vmul.f32 -1.442695, %v627_v32  ;;  %v3246_v36 = vadd.f32 %v2441_v26, %v381_v34 }
 0x196   :  { %v2677_v37 = vpop.f32.mrf.mxu1 }
 0x197   :  { %2906 = vpow2.f32 %v2459_v35  ;;  %v3248_v38 = vadd.f32 %v2677_v37, %v2441_v26 }
 0x198   :  { %v391_v39 = vpop.f32.mrf.mxu1 }
 0x199   :  { %v3250_v40 = vadd.f32 %v2441_v26, %v391_v39 }
 0x19a   :  { %v2680_v41 = vpop.f32.mrf.mxu1 }
 0x19b   :  { %v3252_v42 = vadd.f32 %v2680_v41, %v2441_v26 }
 0x19c   :  { %v401_v43 = vpop.f32.mrf.mxu1 }
 0x19d   :  { %v3254_v44 = vadd.f32 %v2441_v26, %v401_v43 }
 0x19e   :  { %v3256_v47 = vpop.f32.mrf.mxu1 }
 0x1a0   :  { %v3258_v49 = vpop.f32.mrf.mxu1 }
 0x1a2   :  { %v3260_v52 = vpop.f32.mrf.mxu1 }
 0x1a4   :  { %v2907_v45 = vpop.eup %2906  ;;  %v3263_v53 = vpop.f32.mrf.mxu1 }
 0x1a5   :  { %v631_v46 = vadd.f32 1.0, %v2907_v45 }
 0x1a6   :  { %v3265_v54 = vpop.f32.mrf.mxu1 }
 0x1a7   :  { %2908 = vrcp.f32 %v631_v46 }
 0x1a8   :  { %v3267_v55 = vpop.f32.mrf.mxu1 }
 0x1aa   :  { %v2700_v56 = vpop.f32.mrf.mxu1 }
 0x1ac   :  { %v3283_v2 = vpop.f32.mrf.mxu1 }
 0x1b4   :  { %v2909_v50 = vpop.eup %2908 }
 0x1b5   :  { %v643_v51 = vmul.f32 %v2909_v50, %v641_v48 }
 0x1b7   :  { %645 = vrot.lane.b32.xlu1 %v643_v51, %s3004_s29 }
 0x229   :  { %v646_v57 = vpop.permute.xlu1 %645 }
 0x22a   :  { %v648_v58 = vadd.f32 %v646_v57, %v372_v30 }
 0x22c   :  { %2910 = vtanh.f32 %v648_v58 }
 0x239   :  { %v2911_v59 = vpop.eup %2910 }
 0x23a   :  { %v650_v60 = vsub.f32 0.0, %v2911_v59 }
 0x23c   :  { %652 = vrot.lane.b32.xlu1 %v650_v60, %s3005_s17 }
 0x2ae   :  { %v653_v61 = vpop.permute.xlu1 %652 }
 0x2af   :  { %v655_v62 = vmul.f32 %v2909_v50, %v653_v61 }
 0x2b1   :  { %657 = vrot.lane.b32.xlu0 %v655_v62, %s3006_s18 }
 0x323   :  { %v658_v63 = vpop.permute.xlu0 %657 }
 0x324   :  { %v660_v0 = vadd.f32 %v2911_v59, %v658_v63 }
 0x326   :  { %662 = vrot.lane.b32.xlu1 %v660_v0, %s3004_s29 }
 0x398   :  { %v663_v1 = vpop.permute.xlu1 %662 }
 0x399   :  { %2721 = vmatmul.mubr.msk.f32.vlgmr.msra.gmra.mxu1 %vm280_vm2, %v663_v1 }
 0x39a   :  { %2735 = vmatpush3.msra.mxu1 %v3066_v5  ;;  %2742 = vmatprep.mubr.msk.f32.mxu1 %vm3003_vm1, %v3002_v6 }
 0x39b   :  { %2736 = vmatprep.subr.mxu1 %v3002_v6 }
 0x39c   :  { %2737 = vmatpush3.msra.mxu1 %v3073_v7 }
 0x39d   :  { %2738 = vmatprep.subr.mxu1 %v3002_v6 }
 0x39e   :  { %2739 = vmatpush3.msra.mxu1 %v3090_v11 }
 0x39f   :  { %2740 = vmatprep.subr.mxu1 %v3002_v6 }
 0x3a0   :  { %2741 = vmatpush3.msra.mxu1 %v3102_v13 }
 0x3a1   :  { %2756 = vmatprep.subr.mxu1 %v3002_v6 }
 0x459   :  { %v732_v3 = vpop.f32.mrf.mxu1 }
 0x45a   :  { %v743_v8 = vadd.f32 %v732_v3, %v3212_v4  ;;  %v736_v10 = vadd.f32 %v732_v3, %v3242_v28 }
 0x45b   :  { %v2722_v9 = vpop.f32.mrf.mxu1 }
 0x45c   :  { %745 = vrot.lane.b32.xlu0 %v743_v8, %s3004_s29  ;;  %v2461_v12 = vmul.f32 -1.442695, %v736_v10 }
 0x45e   :  { %2912 = vpow2.f32 %v2461_v12 }
 0x46b   :  { %v2913_v14 = vpop.eup %2912 }
 0x46c   :  { %v740_v15 = vadd.f32 1.0, %v2913_v14 }
 0x46e   :  { %2914 = vrcp.f32 %v740_v15 }
 0x47b   :  { %v2915_v16 = vpop.eup %2914 }
 0x4ce   :  { %v746_v17 = vpop.permute.xlu0 %745 }
 0x4cf   :  { %v748_v18 = vmul.f32 %v2915_v16, %v746_v17 }
 0x4d1   :  { %750 = vrot.lane.b32.xlu1 %v748_v18, %s3004_s29 }
 0x543   :  { %v751_v19 = vpop.permute.xlu1 %750 }
 0x544   :  { %v753_v20 = vadd.f32 %v751_v19, %v3242_v28 }
 0x546   :  { %2916 = vtanh.f32 %v753_v20 }
 0x553   :  { %v2917_v21 = vpop.eup %2916 }
 0x554   :  { %v755_v22 = vsub.f32 %v660_v0, %v2917_v21 }
 0x556   :  { %757 = vrot.lane.b32.xlu0 %v755_v22, %s3005_s17 }
 0x5c8   :  { %v758_v23 = vpop.permute.xlu0 %757 }
 0x5c9   :  { %v760_v24 = vmul.f32 %v2915_v16, %v758_v23 }
 0x5cb   :  { %762 = vrot.lane.b32.xlu1 %v760_v24, %s3006_s18 }
 0x63d   :  { %v763_v25 = vpop.permute.xlu1 %762 }
 0x63e   :  { %v765_v26 = vadd.f32 %v2917_v21, %v763_v25 }
 0x640   :  { %767 = vrot.lane.b32.xlu0 %v765_v26, %s3004_s29 }
 0x6b2   :  { %v768_v27 = vpop.permute.xlu0 %767 }
 0x6b3   :  { %2732 = vmatmul.mubr.msk.f32.vlgmr.msra.gmra.mxu0 %vm280_vm2, %v768_v27 }
 0x6b4   :  { %2746 = vmatpush3.msra.mxu0 %v3066_v5  ;;  %2753 = vmatprep.mubr.msk.f32.mxu0 %vm3003_vm1, %v3002_v6 }
 0x6b5   :  { %2747 = vmatprep.subr.mxu0 %v3002_v6 }
 0x6b6   :  { %2748 = vmatpush3.msra.mxu0 %v3073_v7 }
 0x6b7   :  { %2749 = vmatprep.subr.mxu0 %v3002_v6 }
 0x6b8   :  { %2750 = vmatpush3.msra.mxu0 %v3090_v11 }
 0x6b9   :  { %2751 = vmatprep.subr.mxu0 %v3002_v6 }
 0x6ba   :  { %2752 = vmatpush3.msra.mxu0 %v3102_v13 }
 0x6bb   :  { %2767 = vmatprep.subr.mxu0 %v3002_v6 }
 0x773   :  { %v837_v28 = vpop.f32.mrf.mxu0 }
 0x774   :  { %v848_v29 = vadd.f32 %v837_v28, %v3212_v4  ;;  %v841_v31 = vadd.f32 %v837_v28, %v3246_v36 }
 0x775   :  { %v2733_v30 = vpop.f32.mrf.mxu0 }
 0x776   :  { %850 = vrot.lane.b32.xlu1 %v848_v29, %s3004_s29  ;;  %v2463_v32 = vmul.f32 -1.442695, %v841_v31 }
 0x778   :  { %2918 = vpow2.f32 %v2463_v32 }
 0x785   :  { %v2919_v34 = vpop.eup %2918 }
 0x786   :  { %v845_v35 = vadd.f32 1.0, %v2919_v34 }
 0x788   :  { %2920 = vrcp.f32 %v845_v35 }
 0x795   :  { %v2921_v37 = vpop.eup %2920 }
 0x7e8   :  { %v851_v39 = vpop.permute.xlu1 %850 }
 0x7e9   :  { %v853_v41 = vmul.f32 %v2921_v37, %v851_v39 }
 0x7eb   :  { %855 = vrot.lane.b32.xlu0 %v853_v41, %s3004_s29 }
 0x85d   :  { %v856_v43 = vpop.permute.xlu0 %855 }
 0x85e   :  { %v858_v45 = vadd.f32 %v856_v43, %v3246_v36 }
 0x860   :  { %2922 = vtanh.f32 %v858_v45 }
 0x86d   :  { %v2923_v46 = vpop.eup %2922 }
 0x86e   :  { %v860_v48 = vsub.f32 %v765_v26, %v2923_v46 }
 0x870   :  { %862 = vrot.lane.b32.xlu1 %v860_v48, %s3005_s17 }
 0x8e2   :  { %v863_v50 = vpop.permute.xlu1 %862 }
 0x8e3   :  { %v865_v51 = vmul.f32 %v2921_v37, %v863_v50 }
 0x8e5   :  { %867 = vrot.lane.b32.xlu0 %v865_v51, %s3006_s18 }
 0x957   :  { %v868_v56 = vpop.permute.xlu0 %867 }
 0x958   :  { %v870_v57 = vadd.f32 %v2923_v46, %v868_v56 }
 0x95a   :  { %872 = vrot.lane.b32.xlu1 %v870_v57, %s3004_s29 }
 0x9cc   :  { %v873_v58 = vpop.permute.xlu1 %872 }
 0x9cd   :  { %2743 = vmatmul.mubr.msk.f32.vlgmr.msra.gmra.mxu1 %vm280_vm2, %v873_v58 }
 0x9ce   :  { %2757 = vmatpush3.msra.mxu1 %v3066_v5  ;;  %2764 = vmatprep.mubr.msk.f32.mxu1 %vm3003_vm1, %v3002_v6 }
 0x9cf   :  { %2758 = vmatprep.subr.mxu1 %v3002_v6 }
 0x9d0   :  { %2759 = vmatpush3.msra.mxu1 %v3073_v7 }
 0x9d1   :  { %2760 = vmatprep.subr.mxu1 %v3002_v6 }
 0x9d2   :  { %2761 = vmatpush3.msra.mxu1 %v3090_v11 }
 0x9d3   :  { %2762 = vmatprep.subr.mxu1 %v3002_v6 }
 0x9d4   :  { %2763 = vmatpush3.msra.mxu1 %v3102_v13 }
 0x9d5   :  { %2778 = vmatprep.subr.mxu1 %v3002_v6 }
 0xa8d   :  { %v942_v36 = vpop.f32.mrf.mxu1 }
 0xa8e   :  { %v953_v59 = vadd.f32 %v942_v36, %v3212_v4  ;;  %v946_v61 = vadd.f32 %v942_v36, %v3244_v33 }
 0xa8f   :  { %v2744_v60 = vpop.f32.mrf.mxu1 }
 0xa90   :  { %955 = vrot.lane.b32.xlu0 %v953_v59, %s3004_s29  ;;  %v2465_v62 = vmul.f32 -1.442695, %v946_v61 }
 0xa92   :  { %2924 = vpow2.f32 %v2465_v62 }
 0xa9f   :  { %v2925_v63 = vpop.eup %2924 }
 0xaa0   :  { %v950_v0 = vadd.f32 1.0, %v2925_v63 }
 0xaa2   :  { %2926 = vrcp.f32 %v950_v0 }
 0xaaf   :  { %v2927_v1 = vpop.eup %2926 }
 0xb02   :  { %v956_v3 = vpop.permute.xlu0 %955 }
 0xb03   :  { %v958_v8 = vmul.f32 %v2927_v1, %v956_v3 }
 0xb05   :  { %960 = vrot.lane.b32.xlu1 %v958_v8, %s3004_s29 }
 0xb77   :  { %v961_v9 = vpop.permute.xlu1 %960 }
 0xb78   :  { %v963_v10 = vadd.f32 %v961_v9, %v3244_v33 }
 0xb7a   :  { %2928 = vtanh.f32 %v963_v10 }
 0xb87   :  { %v2929_v12 = vpop.eup %2928 }
 0xb88   :  { %v965_v14 = vsub.f32 %v870_v57, %v2929_v12 }
 0xb8a   :  { %967 = vrot.lane.b32.xlu0 %v965_v14, %s3005_s17 }
 0xbfc   :  { %v968_v15 = vpop.permute.xlu0 %967 }
 0xbfd   :  { %v970_v16 = vmul.f32 %v2927_v1, %v968_v15 }
 0xbff   :  { %972 = vrot.lane.b32.xlu1 %v970_v16, %s3006_s18 }
 0xc71   :  { %v973_v17 = vpop.permute.xlu1 %972 }
 0xc72   :  { %v975_v18 = vadd.f32 %v2929_v12, %v973_v17 }
 0xc74   :  { %977 = vrot.lane.b32.xlu0 %v975_v18, %s3004_s29 }
 0xce6   :  { %v978_v19 = vpop.permute.xlu0 %977 }
 0xce7   :  { %2754 = vmatmul.mubr.msk.f32.vlgmr.msra.gmra.mxu0 %vm280_vm2, %v978_v19 }
 0xce8   :  { %2768 = vmatpush3.msra.mxu0 %v3066_v5  ;;  %2775 = vmatprep.mubr.msk.f32.mxu0 %vm3003_vm1, %v3002_v6 }
 0xce9   :  { %2769 = vmatprep.subr.mxu0 %v3002_v6 }
 0xcea   :  { %2770 = vmatpush3.msra.mxu0 %v3073_v7 }
 0xceb   :  { %2771 = vmatprep.subr.mxu0 %v3002_v6 }
 0xcec   :  { %2772 = vmatpush3.msra.mxu0 %v3090_v11 }
 0xced   :  { %2773 = vmatprep.subr.mxu0 %v3002_v6 }
 0xcee   :  { %2774 = vmatpush3.msra.mxu0 %v3102_v13 }
 0xcef   :  { %2789 = vmatprep.subr.mxu0 %v3002_v6 }
 0xda7   :  { %v1047_v33 = vpop.f32.mrf.mxu0 }
 0xda8   :  { %v1058_v20 = vadd.f32 %v1047_v33, %v3212_v4  ;;  %v1051_v22 = vadd.f32 %v1047_v33, %v3250_v40 }
 0xda9   :  { %v2755_v21 = vpop.f32.mrf.mxu0 }
 0xdaa   :  { %1060 = vrot.lane.b32.xlu1 %v1058_v20, %s3004_s29  ;;  %v2467_v23 = vmul.f32 -1.442695, %v1051_v22 }
 0xdac   :  { %2930 = vpow2.f32 %v2467_v23 }
 0xdb9   :  { %v2931_v24 = vpop.eup %2930 }
 0xdba   :  { %v1055_v25 = vadd.f32 1.0, %v2931_v24 }
 0xdbc   :  { %2932 = vrcp.f32 %v1055_v25 }
 0xdc9   :  { %v2933_v26 = vpop.eup %2932 }
 0xe1c   :  { %v1061_v27 = vpop.permute.xlu1 %1060 }
 0xe1d   :  { %v1063_v28 = vmul.f32 %v2933_v26, %v1061_v27 }
 0xe1f   :  { %1065 = vrot.lane.b32.xlu0 %v1063_v28, %s3004_s29 }
 0xe91   :  { %v1066_v29 = vpop.permute.xlu0 %1065 }
 0xe92   :  { %v1068_v30 = vadd.f32 %v1066_v29, %v3250_v40 }
 0xe94   :  { %2934 = vtanh.f32 %v1068_v30 }
 0xea1   :  { %v2935_v31 = vpop.eup %2934 }
 0xea2   :  { %v1070_v32 = vsub.f32 %v975_v18, %v2935_v31 }
 0xea4   :  { %1072 = vrot.lane.b32.xlu1 %v1070_v32, %s3005_s17 }
 0xf16   :  { %v1073_v34 = vpop.permute.xlu1 %1072 }
 0xf17   :  { %v1075_v35 = vmul.f32 %v2933_v26, %v1073_v34 }
 0xf19   :  { %1077 = vrot.lane.b32.xlu0 %v1075_v35, %s3006_s18 }
 0xf8b   :  { %v1078_v37 = vpop.permute.xlu0 %1077 }
 0xf8c   :  { %v1080_v39 = vadd.f32 %v2935_v31, %v1078_v37  ;;  %v1396_v37 = vld [vmem:[%s3654_s1] sm:$0xff] }
 0xf8e   :  { %1082 = vrot.lane.b32.xlu1 %v1080_v39, %s3004_s29 }
0x1000   :  { %v1083_v41 = vpop.permute.xlu1 %1082 }
0x1001   :  { %2765 = vmatmul.mubr.msk.f32.vlgmr.msra.gmra.mxu1 %vm280_vm2, %v1083_v41  ;;  %v3409_v41 = vld [vmem:[%s3651_s4 + $0x28] sm:$0xff] }
0x1002   :  { %2779 = vmatpush3.msra.mxu1 %v3066_v5  ;;  %2786 = vmatprep.mubr.msk.f32.mxu1 %vm3003_vm1, %v3002_v6 }
0x1003   :  { %2780 = vmatprep.subr.mxu1 %v3002_v6 }
0x1004   :  { %2781 = vmatpush3.msra.mxu1 %v3073_v7 }
0x1005   :  { %2782 = vmatprep.subr.mxu1 %v3002_v6 }
0x1006   :  { %2783 = vmatpush3.msra.mxu1 %v3090_v11 }
0x1007   :  { %2784 = vmatprep.subr.mxu1 %v3002_v6 }
0x1008   :  { %2785 = vmatpush3.msra.mxu1 %v3102_v13 }
0x1009   :  { %2800 = vmatprep.subr.mxu1 %v3002_v6 }
0x10c1   :  { %v1152_v40 = vpop.f32.mrf.mxu1 }
0x10c2   :  { %v1163_v5 = vadd.f32 %v1152_v40, %v3212_v4  ;;  %v1156_v45 = vadd.f32 %v1152_v40, %v3248_v38  ;;  %v3418_v40 = vld [vmem:[%s3651_s4 + $0x20] sm:$0xff] }
0x10c3   :  { %v2766_v43 = vpop.f32.mrf.mxu1 }
0x10c4   :  { %1165 = vrot.lane.b32.xlu0 %v1163_v5, %s3004_s29  ;;  %v2469_v46 = vmul.f32 -1.442695, %v1156_v45  ;;  %v2423_v45 = vld [vmem:[%s3653_s6 + $0x3] ss:$0 sm:$0xff] }
0x10c6   :  { %2936 = vpow2.f32 %v2469_v46 }
0x10d3   :  { %v2937_v7 = vpop.eup %2936 }
0x10d4   :  { %v1160_v48 = vadd.f32 1.0, %v2937_v7 }
0x10d6   :  { %2938 = vrcp.f32 %v1160_v48 }
0x10e3   :  { %v2939_v11 = vpop.eup %2938 }
0x1136   :  { %v1166_v50 = vpop.permute.xlu0 %1165 }
0x1137   :  { %v1168_v51 = vmul.f32 %v2939_v11, %v1166_v50 }
0x1139   :  { %1170 = vrot.lane.b32.xlu1 %v1168_v51, %s3004_s29 }
0x11ab   :  { %v1171_v13 = vpop.permute.xlu1 %1170 }
0x11ac   :  { %v1173_v56 = vadd.f32 %v1171_v13, %v3248_v38 }
0x11ae   :  { %2940 = vtanh.f32 %v1173_v56 }
0x11bb   :  { %v2941_v57 = vpop.eup %2940 }
0x11bc   :  { %v1175_v58 = vsub.f32 %v1080_v39, %v2941_v57  ;;  %v3396_v39 = vld [vmem:[%s3651_s4 + $0x38] sm:$0xff] }
0x11be   :  { %1177 = vrot.lane.b32.xlu0 %v1175_v58, %s3005_s17  ;;  %v3453_v58 = vld [vmem:[%s3653_s6 + $0x1] ss:$0 sm:$0xff] }
0x1230   :  { %v1178_v36 = vpop.permute.xlu0 %1177 }
0x1231   :  { %v1180_v59 = vmul.f32 %v2939_v11, %v1178_v36 }
0x1233   :  { %1182 = vrot.lane.b32.xlu1 %v1180_v59, %s3006_s18 }
0x12a5   :  { %v1183_v60 = vpop.permute.xlu1 %1182 }
0x12a6   :  { %v1185_v61 = vadd.f32 %v2941_v57, %v1183_v60 }
0x12a8   :  { %1187 = vrot.lane.b32.xlu0 %v1185_v61, %s3004_s29 }
0x131a   :  { %v1188_v62 = vpop.permute.xlu0 %1187 }
0x131b   :  { %2776 = vmatmul.mubr.msk.f32.vlgmr.msra.gmra.mxu0 %vm280_vm2, %v1188_v62 }
0x131c   :  { %2797 = vmatprep.mubr.msk.f32.mxu0 %vm3003_vm1, %v3002_v6  ;;  %2790 = vmatpush3.msra.mxu0 %v3396_v39 }
0x131d   :  { %2791 = vmatprep.subr.mxu0 %v3002_v6 }
0x13db   :  { %v1257_v38 = vpop.f32.mrf.mxu0 }
0x13dc   :  { %v1268_v63 = vadd.f32 %v1257_v38, %v3212_v4  ;;  %v1261_v1 = vadd.f32 %v1257_v38, %v3254_v44 }
0x13dd   :  { %v2777_v0 = vpop.f32.mrf.mxu0 }
0x13de   :  { %1270 = vrot.lane.b32.xlu1 %v1268_v63, %s3004_s29  ;;  %v2471_v3 = vmul.f32 -1.442695, %v1261_v1 }
0x13e0   :  { %2942 = vpow2.f32 %v2471_v3 }
0x13ed   :  { %v2943_v8 = vpop.eup %2942 }
0x13ee   :  { %v1265_v9 = vadd.f32 1.0, %v2943_v8 }
0x13f0   :  { %2944 = vrcp.f32 %v1265_v9 }
0x13fd   :  { %v2945_v10 = vpop.eup %2944 }
0x1450   :  { %v1271_v12 = vpop.permute.xlu1 %1270 }
0x1451   :  { %v1273_v14 = vmul.f32 %v2945_v10, %v1271_v12 }
0x1453   :  { %1275 = vrot.lane.b32.xlu0 %v1273_v14, %s3004_s29 }
0x14c5   :  { %v1276_v15 = vpop.permute.xlu0 %1275 }
0x14c6   :  { %v1278_v16 = vadd.f32 %v1276_v15, %v3254_v44 }
0x14c8   :  { %2946 = vtanh.f32 %v1278_v16 }
0x14d5   :  { %v2947_v17 = vpop.eup %2946 }
0x14d6   :  { %v1280_v18 = vsub.f32 %v1185_v61, %v2947_v17 }
0x14d8   :  { %1282 = vrot.lane.b32.xlu1 %v1280_v18, %s3005_s17 }
0x154a   :  { %v1283_v19 = vpop.permute.xlu1 %1282 }
0x154b   :  { %v1285_v33 = vmul.f32 %v2945_v10, %v1283_v19  ;;  %v509_v19 = vadd.f32 %v3453_v58, %v3258_v49 }
0x154d   :  { %1287 = vrot.lane.b32.xlu0 %v1285_v33, %s3006_s18 }
0x15bf   :  { %v1288_v20 = vpop.permute.xlu0 %1287 }
0x15c0   :  { %v1290_v21 = vadd.f32 %v2947_v17, %v1288_v20 }
0x15c2   :  { %1292 = vrot.lane.b32.xlu1 %v1290_v21, %s3004_s29 }
0x1634   :  { %v1293_v22 = vpop.permute.xlu1 %1292 }
0x1635   :  { %2787 = vmatmul.mubr.msk.f32.vlgmr.msra.gmra.mxu1 %vm280_vm2, %v1293_v22 }
0x1636   :  { %2808 = vmatprep.mubr.msk.f32.mxu1 %vm3003_vm1, %v3002_v6  ;;  %2801 = vmatpush3.msra.mxu1 %v3396_v39 }
0x1637   :  { %2802 = vmatprep.subr.mxu1 %v3002_v6 }
0x16f5   :  { %v1362_v44 = vpop.f32.mrf.mxu1 }
0x16f6   :  { %v1373_v23 = vadd.f32 %v1362_v44, %v3212_v4  ;;  %v1366_v25 = vadd.f32 %v1362_v44, %v3252_v42 }
0x16f7   :  { %v2788_v24 = vpop.f32.mrf.mxu1 }
0x16f8   :  { %1375 = vrot.lane.b32.xlu0 %v1373_v23, %s3004_s29  ;;  %v2473_v26 = vmul.f32 -1.442695, %v1366_v25 }
0x16fa   :  { %2948 = vpow2.f32 %v2473_v26 }
0x1707   :  { %v2949_v27 = vpop.eup %2948 }
0x1708   :  { %v1370_v28 = vadd.f32 1.0, %v2949_v27 }
0x170a   :  { %2950 = vrcp.f32 %v1370_v28 }
0x1717   :  { %v2951_v29 = vpop.eup %2950 }
0x176a   :  { %v1376_v30 = vpop.permute.xlu0 %1375 }
0x176b   :  { %v1378_v31 = vmul.f32 %v2951_v29, %v1376_v30 }
0x176d   :  { %1380 = vrot.lane.b32.xlu1 %v1378_v31, %s3004_s29 }
0x17df   :  { %v1381_v32 = vpop.permute.xlu1 %1380 }
0x17e0   :  { %v1383_v34 = vadd.f32 %v1381_v32, %v3252_v42  ;;  %v3401_v42 = vld [vmem:[%s3651_s4 + $0x30] sm:$0xff] }
0x17e1   :  { %2792 = vmatpush3.msra.mxu0 %v3401_v42  ;;  %2803 = vmatpush3.msra.mxu1 %v3401_v42 }
0x17e2   :  { %2952 = vtanh.f32 %v1383_v34  ;;  %2793 = vmatprep.subr.mxu0 %v3002_v6  ;;  %2804 = vmatprep.subr.mxu1 %v3002_v6 }
0x17e3   :  { %2794 = vmatpush3.msra.mxu0 %v3409_v41  ;;  %2805 = vmatpush3.msra.mxu1 %v3409_v41 }
0x17e4   :  { %2795 = vmatprep.subr.mxu0 %v3002_v6  ;;  %2806 = vmatprep.subr.mxu1 %v3002_v6 }
0x17e5   :  { %2796 = vmatpush3.msra.mxu0 %v3418_v40  ;;  %2807 = vmatpush3.msra.mxu1 %v3418_v40 }
0x17e6   :  { %2811 = vmatprep.subr.mxu0 %v3002_v6  ;;  %2822 = vmatprep.subr.mxu1 %v3002_v6 }
0x17ef   :  { %v2953_v4 = vpop.eup %2952 }
0x17f0   :  { %v1385_v35 = vsub.f32 %v1290_v21, %v2953_v4 }
0x17f2   :  { %1387 = vrot.lane.b32.xlu0 %v1385_v35, %s3005_s17 }
0x17f6   :  { %1398 = vrot.lane.b32.xlu0 %v1396_v37, %s3004_s29  ;;  %v514_v37 = vadd.f32 %v3256_v47, %v3453_v58 }
0x17fa   :  { %1485 = vrot.lane.b32.xlu0 %v2423_v45, %s3004_s29 }
0x1864   :  { %v1388_v5 = vpop.permute.xlu0 %1387 }
0x1865   :  { %v1390_v43 = vmul.f32 %v2951_v29, %v1388_v5 }
0x1867   :  { %1392 = vrot.lane.b32.xlu1 %v1390_v43, %s3006_s18 }
0x1868   :  { %v1399_v7 = vpop.permute.xlu0 %1398 }
0x186c   :  { %v3446_v51 = vpop.permute.xlu0 %1485 }
0x18d9   :  { %v1393_v46 = vpop.permute.xlu1 %1392 }
0x18da   :  { %v1395_v48 = vadd.f32 %v2953_v4, %v1393_v46 }
0x18dc   :  { %v1401_v11 = vadd.f32 %v1399_v7, %v1395_v48 }
0x18de   :  { %1403 = vrot.lane.b32.xlu1 %v1401_v11, %s3004_s29 }
0x1950   :  { %v1404_v50 = vpop.permute.xlu1 %1403 }
0x1951   :  { %2798 = vmatmul.mubr.msk.f32.vlgmr.msra.gmra.mxu0 %vm280_vm2, %v1404_v50 }
0x1952   :  { %2812 = vmatpush3.msra.mxu0 %v3396_v39  ;;  %2819 = vmatprep.mubr.msk.f32.mxu0 %vm3003_vm1, %v3002_v6 }
0x1953   :  { %2813 = vmatprep.subr.mxu0 %v3002_v6 }
0x1954   :  { %2814 = vmatpush3.msra.mxu0 %v3401_v42 }
0x1955   :  { %2815 = vmatprep.subr.mxu0 %v3002_v6 }
0x1956   :  { %2816 = vmatpush3.msra.mxu0 %v3409_v41 }
0x1957   :  { %2817 = vmatprep.subr.mxu0 %v3002_v6 }
0x1958   :  { %2818 = vmatpush3.msra.mxu0 %v3418_v40 }
0x1959   :  { %2833 = vmatprep.subr.mxu0 %v3002_v6 }
0x1a11   :  { %v1473_v13 = vpop.f32.mrf.mxu0 }
0x1a12   :  { %v1488_v56 = vadd.f32 %v3446_v51, %v1473_v13  ;;  %v1477_v36 = vadd.f32 %v3453_v58, %v1473_v13 }
0x1a13   :  { %v2799_v57 = vpop.f32.mrf.mxu0 }
0x1a14   :  { %1490 = vrot.lane.b32.xlu1 %v1488_v56, %s3004_s29  ;;  %v2475_v59 = vmul.f32 -1.442695, %v1477_v36 }
0x1a16   :  { %2954 = vpow2.f32 %v2475_v59 }
0x1a23   :  { %v2955_v60 = vpop.eup %2954 }
0x1a24   :  { %v1481_v61 = vadd.f32 1.0, %v2955_v60 }
0x1a26   :  { %2956 = vrcp.f32 %v1481_v61 }
0x1a33   :  { %v2957_v62 = vpop.eup %2956 }
0x1a86   :  { %v1491_v38 = vpop.permute.xlu1 %1490 }
0x1a87   :  { %v1493_v63 = vmul.f32 %v2957_v62, %v1491_v38 }
0x1a89   :  { %1495 = vrot.lane.b32.xlu0 %v1493_v63, %s3004_s29 }
0x1afb   :  { %v1496_v0 = vpop.permute.xlu0 %1495 }
0x1afc   :  { %v1498_v1 = vadd.f32 %v3453_v58, %v1496_v0  ;;  %v519_v0 = vadd.f32 %v3453_v58, %v3263_v53 }
0x1afe   :  { %2958 = vtanh.f32 %v1498_v1 }
0x1b0b   :  { %v2959_v3 = vpop.eup %2958 }
0x1b0c   :  { %v1500_v8 = vsub.f32 %v1401_v11, %v2959_v3 }
0x1b0e   :  { %1502 = vrot.lane.b32.xlu1 %v1500_v8, %s3005_s17 }
0x1b80   :  { %v1503_v9 = vpop.permute.xlu1 %1502 }
0x1b81   :  { %v1505_v10 = vmul.f32 %v2957_v62, %v1503_v9 }
0x1b83   :  { %1507 = vrot.lane.b32.xlu0 %v1505_v10, %s3006_s18 }
0x1bf5   :  { %v1508_v12 = vpop.permute.xlu0 %1507 }
0x1bf6   :  { %v1510_v14 = vadd.f32 %v2959_v3, %v1508_v12 }
0x1bf8   :  { %1512 = vrot.lane.b32.xlu1 %v1510_v14, %s3004_s29 }
0x1c6a   :  { %v1513_v15 = vpop.permute.xlu1 %1512 }
0x1c6b   :  { %1515 = vst.msk [vmem:[#allocation2] sm:$0xff] %vm280_vm2, %v1513_v15  ;;  %2809 = vmatmul.mubr.msk.f32.vlgmr.msra.gmra.mxu1 %vm280_vm2, %v1513_v15 }
0x1c6c   :  { %2823 = vmatpush3.msra.mxu1 %v3396_v39  ;;  %2830 = vmatprep.mubr.msk.f32.mxu1 %vm3003_vm1, %v3002_v6 }
0x1c6d   :  { %2824 = vmatprep.subr.mxu1 %v3002_v6 }
0x1c6e   :  { %2825 = vmatpush3.msra.mxu1 %v3401_v42 }
0x1c6f   :  { %2826 = vmatprep.subr.mxu1 %v3002_v6 }
0x1c70   :  { %2827 = vmatpush3.msra.mxu1 %v3409_v41 }
0x1c71   :  { %2828 = vmatprep.subr.mxu1 %v3002_v6 }
0x1c72   :  { %2829 = vmatpush3.msra.mxu1 %v3418_v40 }
0x1c73   :  { %2844 = vmatprep.subr.mxu1 %v3002_v6 }
0x1d2b   :  { %v1584_v16 = vpop.f32.mrf.mxu1 }
0x1d2c   :  { %v1595_v17 = vadd.f32 %v1584_v16, %v3446_v51  ;;  %v1588_v33 = vadd.f32 %v1584_v16, %v509_v19 }
0x1d2d   :  { %v2810_v18 = vpop.f32.mrf.mxu1 }
0x1d2e   :  { %1597 = vrot.lane.b32.xlu0 %v1595_v17, %s3004_s29  ;;  %v2477_v20 = vmul.f32 -1.442695, %v1588_v33 }
0x1d30   :  { %2960 = vpow2.f32 %v2477_v20 }
0x1d3d   :  { %v2961_v21 = vpop.eup %2960 }
0x1d3e   :  { %v1592_v22 = vadd.f32 1.0, %v2961_v21 }
0x1d40   :  { %2962 = vrcp.f32 %v1592_v22 }
0x1d4d   :  { %v2963_v44 = vpop.eup %2962 }
0x1da0   :  { %v1598_v23 = vpop.permute.xlu0 %1597 }
0x1da1   :  { %v1600_v24 = vmul.f32 %v2963_v44, %v1598_v23 }
0x1da3   :  { %1602 = vrot.lane.b32.xlu1 %v1600_v24, %s3004_s29  ;;  %v524_v24 = vadd.f32 %v3260_v52, %v3453_v58 }
0x1e15   :  { %v1603_v25 = vpop.permute.xlu1 %1602 }
0x1e16   :  { %v1605_v26 = vadd.f32 %v1603_v25, %v509_v19 }
0x1e18   :  { %2964 = vtanh.f32 %v1605_v26 }
0x1e25   :  { %v2965_v27 = vpop.eup %2964 }
0x1e26   :  { %v1607_v28 = vsub.f32 %v1510_v14, %v2965_v27 }
0x1e28   :  { %1609 = vrot.lane.b32.xlu0 %v1607_v28, %s3005_s17 }
0x1e9a   :  { %v1610_v29 = vpop.permute.xlu0 %1609 }
0x1e9b   :  { %v1612_v49 = vmul.f32 %v2963_v44, %v1610_v29 }
0x1e9d   :  { %1614 = vrot.lane.b32.xlu1 %v1612_v49, %s3006_s18 }
0x1f0f   :  { %v1615_v30 = vpop.permute.xlu1 %1614 }
0x1f10   :  { %v1617_v31 = vadd.f32 %v2965_v27, %v1615_v30 }
0x1f12   :  { %1619 = vrot.lane.b32.xlu0 %v1617_v31, %s3004_s29 }
0x1f84   :  { %v1620_v32 = vpop.permute.xlu0 %1619 }
0x1f85   :  { %1622 = vst.msk [vmem:[#allocation2 + $0x8] sm:$0xff] %vm280_vm2, %v1620_v32  ;;  %2820 = vmatmul.mubr.msk.f32.vlgmr.msra.gmra.mxu0 %vm280_vm2, %v1620_v32 }
0x1f86   :  { %2834 = vmatpush3.msra.mxu0 %v3396_v39  ;;  %2841 = vmatprep.mubr.msk.f32.mxu0 %vm3003_vm1, %v3002_v6 }
0x1f87   :  { %2835 = vmatprep.subr.mxu0 %v3002_v6 }
0x1f88   :  { %2836 = vmatpush3.msra.mxu0 %v3401_v42 }
0x1f89   :  { %2837 = vmatprep.subr.mxu0 %v3002_v6 }
0x1f8a   :  { %2838 = vmatpush3.msra.mxu0 %v3409_v41 }
0x1f8b   :  { %2839 = vmatprep.subr.mxu0 %v3002_v6 }
0x1f8c   :  { %2840 = vmatpush3.msra.mxu0 %v3418_v40 }
0x1f8d   :  { %2855 = vmatprep.subr.mxu0 %v3002_v6 }
0x2045   :  { %v1691_v34 = vpop.f32.mrf.mxu0 }
0x2046   :  { %v1702_v4 = vadd.f32 %v1691_v34, %v3446_v51  ;;  %v1695_v5 = vadd.f32 %v1691_v34, %v514_v37 }
0x2047   :  { %v2821_v35 = vpop.f32.mrf.mxu0 }
0x2048   :  { %1704 = vrot.lane.b32.xlu1 %v1702_v4, %s3004_s29  ;;  %v2479_v43 = vmul.f32 -1.442695, %v1695_v5 }
0x204a   :  { %2966 = vpow2.f32 %v2479_v43 }
0x2057   :  { %v2967_v45 = vpop.eup %2966 }
0x2058   :  { %v1699_v46 = vadd.f32 1.0, %v2967_v45 }
0x205a   :  { %2968 = vrcp.f32 %v1699_v46 }
0x2067   :  { %v2969_v7 = vpop.eup %2968 }
0x20ba   :  { %v1705_v48 = vpop.permute.xlu1 %1704 }
0x20bb   :  { %v1707_v11 = vmul.f32 %v2969_v7, %v1705_v48 }
0x20bd   :  { %1709 = vrot.lane.b32.xlu0 %v1707_v11, %s3004_s29 }
0x212f   :  { %v1710_v50 = vpop.permute.xlu0 %1709 }
0x2130   :  { %v1712_v13 = vadd.f32 %v1710_v50, %v514_v37 }
0x2132   :  { %2970 = vtanh.f32 %v1712_v13 }
0x213f   :  { %v2971_v56 = vpop.eup %2970 }
0x2140   :  { %v1714_v57 = vsub.f32 %v1617_v31, %v2971_v56 }
0x2142   :  { %1716 = vrot.lane.b32.xlu1 %v1714_v57, %s3005_s17 }
0x21b4   :  { %v1717_v36 = vpop.permute.xlu1 %1716 }
0x21b5   :  { %v1719_v47 = vmul.f32 %v2969_v7, %v1717_v36 }
0x21b7   :  { %1721 = vrot.lane.b32.xlu0 %v1719_v47, %s3006_s18 }
0x2229   :  { %v1722_v59 = vpop.permute.xlu0 %1721 }
0x222a   :  { %v1724_v60 = vadd.f32 %v2971_v56, %v1722_v59 }
0x222c   :  { %1726 = vrot.lane.b32.xlu1 %v1724_v60, %s3004_s29 }
0x229e   :  { %v1727_v61 = vpop.permute.xlu1 %1726 }
0x229f   :  { %1729 = vst.msk [vmem:[#allocation2 + $0x10] sm:$0xff] %vm280_vm2, %v1727_v61  ;;  %2831 = vmatmul.mubr.msk.f32.vlgmr.msra.gmra.mxu1 %vm280_vm2, %v1727_v61 }
0x22a0   :  { %2845 = vmatpush3.msra.mxu1 %v3396_v39  ;;  %2852 = vmatprep.mubr.msk.f32.mxu1 %vm3003_vm1, %v3002_v6 }
0x22a1   :  { %2846 = vmatprep.subr.mxu1 %v3002_v6 }
0x22a2   :  { %2847 = vmatpush3.msra.mxu1 %v3401_v42 }
0x22a3   :  { %2848 = vmatprep.subr.mxu1 %v3002_v6 }
0x22a4   :  { %2849 = vmatpush3.msra.mxu1 %v3409_v41 }
0x22a5   :  { %2850 = vmatprep.subr.mxu1 %v3002_v6 }
0x22a6   :  { %2851 = vmatpush3.msra.mxu1 %v3418_v40 }
0x22a7   :  { %2866 = vmatprep.subr.mxu1 %v3002_v6 }
0x235f   :  { %v1798_v62 = vpop.f32.mrf.mxu1 }
0x2360   :  { %v1809_v38 = vadd.f32 %v1798_v62, %v3446_v51  ;;  %v1802_v1 = vadd.f32 %v1798_v62, %v519_v0 }
0x2361   :  { %v2832_v63 = vpop.f32.mrf.mxu1 }
0x2362   :  { %1811 = vrot.lane.b32.xlu0 %v1809_v38, %s3004_s29  ;;  %v2481_v3 = vmul.f32 -1.442695, %v1802_v1  ;;  %v2275_v38 = vld [vmem:[%s3655_s5 + $0x10] sm:$0xff]  ;;  %v2265_v63 = vld [vmem:[#allocation2] sm:$0xff] }
0x2363   :  { %v2273_v1 = vld [vmem:[%s3655_s5] sm:$0xff] }
0x2364   :  { %2972 = vpow2.f32 %v2481_v3  ;;  %v2266_v3 = vld [vmem:[#allocation2 + $0x8] sm:$0xff] }
0x2371   :  { %v2973_v8 = vpop.eup %2972 }
0x2372   :  { %v1806_v9 = vadd.f32 1.0, %v2973_v8  ;;  %v2267_v8 = vld [vmem:[#allocation2 + $0x10] sm:$0xff] }
0x2374   :  { %2974 = vrcp.f32 %v1806_v9 }
0x2381   :  { %v2975_v10 = vpop.eup %2974 }
0x23d4   :  { %v1812_v12 = vpop.permute.xlu0 %1811 }
0x23d5   :  { %v1814_v14 = vmul.f32 %v2975_v10, %v1812_v12 }
0x23d7   :  { %1816 = vrot.lane.b32.xlu1 %v1814_v14, %s3004_s29 }
0x2449   :  { %v1817_v15 = vpop.permute.xlu1 %1816 }
0x244a   :  { %v1819_v16 = vadd.f32 %v1817_v15, %v519_v0  ;;  %v2274_v0 = vld [vmem:[%s3655_s5 + $0x8] sm:$0xff] }
0x244c   :  { %2976 = vtanh.f32 %v1819_v16 }
0x2459   :  { %v2977_v17 = vpop.eup %2976 }
0x245a   :  { %v1821_v18 = vsub.f32 %v1724_v60, %v2977_v17 }
0x245c   :  { %1823 = vrot.lane.b32.xlu0 %v1821_v18, %s3005_s17 }
0x24ce   :  { %v1824_v19 = vpop.permute.xlu0 %1823 }
0x24cf   :  { %v1826_v53 = vmul.f32 %v2975_v10, %v1824_v19 }
0x24d1   :  { %1828 = vrot.lane.b32.xlu1 %v1826_v53, %s3006_s18 }
0x2543   :  { %v1829_v33 = vpop.permute.xlu1 %1828 }
0x2544   :  { %v1831_v20 = vadd.f32 %v2977_v17, %v1829_v33  ;;  %v3587_v17 = vld [vmem:[%s3653_s6 + $0x5] ss:$0 sm:$0xff] }
0x2546   :  { %1833 = vrot.lane.b32.xlu0 %v1831_v20, %s3004_s29 }
0x25b8   :  { %v1834_v21 = vpop.permute.xlu0 %1833 }
0x25b9   :  { %1836 = vst.msk [vmem:[#allocation2 + $0x18] sm:$0xff] %vm280_vm2, %v1834_v21  ;;  %2842 = vmatmul.mubr.msk.f32.vlgmr.msra.gmra.mxu0 %vm280_vm2, %v1834_v21 }
0x25ba   :  { %2856 = vmatpush3.msra.mxu0 %v3396_v39  ;;  %2863 = vmatprep.mubr.msk.f32.mxu0 %vm3003_vm1, %v3002_v6 }
0x25bb   :  { %2857 = vmatprep.subr.mxu0 %v3002_v6 }
0x25bc   :  { %2858 = vmatpush3.msra.mxu0 %v3401_v42 }
0x25bd   :  { %2859 = vmatprep.subr.mxu0 %v3002_v6 }
0x25be   :  { %2860 = vmatpush3.msra.mxu0 %v3409_v41 }
0x25bf   :  { %2861 = vmatprep.subr.mxu0 %v3002_v6 }
0x25c0   :  { %2862 = vmatpush3.msra.mxu0 %v3418_v40  ;;  %v2268_v9 = vld [vmem:[#allocation2 + $0x18] sm:$0xff] }
0x2679   :  { %v1905_v22 = vpop.f32.mrf.mxu0 }
0x267a   :  { %v1916_v44 = vadd.f32 %v1905_v22, %v3446_v51  ;;  %v1909_v25 = vadd.f32 %v1905_v22, %v524_v24 }
0x267b   :  { %v2843_v23 = vpop.f32.mrf.mxu0 }
0x267c   :  { %1918 = vrot.lane.b32.xlu1 %v1916_v44, %s3004_s29  ;;  %v2483_v26 = vmul.f32 -1.442695, %v1909_v25 }
0x267e   :  { %2978 = vpow2.f32 %v2483_v26 }
0x268b   :  { %v2979_v27 = vpop.eup %2978 }
0x268c   :  { %v1913_v28 = vadd.f32 1.0, %v2979_v27  ;;  %v534_v27 = vadd.f32 %v3265_v54, %v3453_v58 }
0x268e   :  { %2980 = vrcp.f32 %v1913_v28 }
0x269b   :  { %v2981_v29 = vpop.eup %2980 }
0x26ee   :  { %v1919_v49 = vpop.permute.xlu1 %1918 }
0x26ef   :  { %v1921_v30 = vmul.f32 %v2981_v29, %v1919_v49 }
0x26f1   :  { %1923 = vrot.lane.b32.xlu0 %v1921_v30, %s3004_s29 }
0x2763   :  { %v1924_v31 = vpop.permute.xlu0 %1923 }
0x2764   :  { %v1926_v32 = vadd.f32 %v1924_v31, %v524_v24 }
0x2766   :  { %2982 = vtanh.f32 %v1926_v32 }
0x2773   :  { %v2983_v34 = vpop.eup %2982 }
0x2774   :  { %v1928_v4 = vsub.f32 %v1831_v20, %v2983_v34 }
0x2776   :  { %1930 = vrot.lane.b32.xlu1 %v1928_v4, %s3005_s17 }
0x27e8   :  { %v1931_v35 = vpop.permute.xlu1 %1930 }
0x27e9   :  { %v1933_v52 = vmul.f32 %v2981_v29, %v1931_v35 }
0x27eb   :  { %1935 = vrot.lane.b32.xlu0 %v1933_v52, %s3006_s18 }
0x285d   :  { %v1936_v37 = vpop.permute.xlu0 %1935 }
0x285e   :  { %v1938_v5 = vadd.f32 %v2983_v34, %v1936_v37 }
0x2860   :  { %1940 = vrot.lane.b32.xlu1 %v1938_v5, %s3004_s29 }
0x28d2   :  { %v1941_v43 = vpop.permute.xlu1 %1940 }
0x28d3   :  { %1943 = vst.msk [vmem:[#allocation2 + $0x20] sm:$0xff] %vm280_vm2, %v1941_v43  ;;  %2853 = vmatmul.mubr.msk.f32.vlgmr.msra.gmra.mxu1 %vm280_vm2, %v1941_v43 }
0x28d4   :  { %2867 = vmatpush3.msra.mxu1 %v3396_v39  ;;  %2874 = vmatprep.mubr.msk.f32.mxu1 %vm3003_vm1, %v3002_v6  ;;  %v529_v39 = vadd.f32 %v3453_v58, %v3267_v55  ;;  %v2276_v55 = vld [vmem:[%s3655_s5 + $0x18] sm:$0xff] }
0x28d5   :  { %2868 = vmatprep.subr.mxu1 %v3002_v6  ;;  %2877 = vmatprep.subr.mxu0 %v2276_v55 }
0x28d6   :  { %2869 = vmatpush3.msra.mxu1 %v3401_v42 }
0x28d7   :  { %2870 = vmatprep.subr.mxu1 %v3002_v6 }
0x28d8   :  { %2871 = vmatpush3.msra.mxu1 %v3409_v41 }
0x28d9   :  { %2872 = vmatprep.subr.mxu1 %v3002_v6 }
0x28da   :  { %2873 = vmatpush3.msra.mxu1 %v3418_v40  ;;  %v2269_v10 = vld [vmem:[#allocation2 + $0x20] sm:$0xff] }
0x2993   :  { %v2012_v45 = vpop.f32.mrf.mxu1 }
0x2994   :  { %v2023_v46 = vadd.f32 %v2012_v45, %v3446_v51  ;;  %v2016_v48 = vadd.f32 %v2012_v45, %v529_v39 }
0x2995   :  { %v2854_v7 = vpop.f32.mrf.mxu1 }
0x2996   :  { %2025 = vrot.lane.b32.xlu0 %v2023_v46, %s3004_s29  ;;  %v2485_v11 = vmul.f32 -1.442695, %v2016_v48 }
0x2998   :  { %2984 = vpow2.f32 %v2485_v11 }
0x29a5   :  { %v2985_v42 = vpop.eup %2984 }
0x29a6   :  { %v2020_v50 = vadd.f32 1.0, %v2985_v42  ;;  %v539_v42 = vadd.f32 %v3453_v58, %v3283_v2 }
0x29a8   :  { %2986 = vrcp.f32 %v2020_v50 }
0x29b5   :  { %v2987_v41 = vpop.eup %2986 }
0x2a08   :  { %v2026_v13 = vpop.permute.xlu0 %2025 }
0x2a09   :  { %v2028_v6 = vmul.f32 %v2987_v41, %v2026_v13 }
0x2a0b   :  { %2030 = vrot.lane.b32.xlu1 %v2028_v6, %s3004_s29 }
0x2a7d   :  { %v2031_v40 = vpop.permute.xlu1 %2030 }
0x2a7e   :  { %v2033_v56 = vadd.f32 %v2031_v40, %v529_v39 }
0x2a80   :  { %2988 = vtanh.f32 %v2033_v56 }
0x2a8d   :  { %v2989_v57 = vpop.eup %2988 }
0x2a8e   :  { %v2035_v36 = vsub.f32 %v1938_v5, %v2989_v57 }
0x2a90   :  { %2037 = vrot.lane.b32.xlu0 %v2035_v36, %s3005_s17 }
0x2b02   :  { %v2038_v47 = vpop.permute.xlu0 %2037 }
0x2b03   :  { %v2040_v59 = vmul.f32 %v2987_v41, %v2038_v47 }
0x2b05   :  { %2042 = vrot.lane.b32.xlu1 %v2040_v59, %s3006_s18 }
0x2b77   :  { %v2043_v60 = vpop.permute.xlu1 %2042 }
0x2b78   :  { %v3561_v61 = vadd.f32 %v2989_v57, %v2043_v60 }
0x2b7a   :  { %2047 = vrot.lane.b32.xlu0 %v3561_v61, %s3004_s29 }
0x2bec   :  { %v2048_v62 = vpop.permute.xlu0 %2047 }
0x2bed   :  { %2050 = vst.msk [vmem:[#allocation2 + $0x28] sm:$0xff] %vm280_vm2, %v2048_v62  ;;  %2864 = vmatmul.mubr.msk.f32.vlgmr.msra.gmra.mxu0 %vm280_vm2, %v2048_v62 }
0x2bee   :  { %2878 = vmatpush3.msra.mxu0 %v2276_v55  ;;  %2885 = vmatprep.mubr.msk.f32.mxu0 %vm280_vm2, %v2265_v63 }
0x2bef   :  { %2879 = vmatprep.subr.mxu0 %v2275_v38 }
0x2bf0   :  { %2880 = vmatpush3.msra.mxu0 %v2275_v38 }
0x2bf1   :  { %2881 = vmatprep.subr.mxu0 %v2274_v0 }
0x2bf2   :  { %2882 = vmatpush3.msra.mxu0 %v2274_v0 }
0x2bf3   :  { %2883 = vmatprep.subr.mxu0 %v2273_v1 }
0x2bf4   :  { %2884 = vmatpush3.msra.mxu0 %v2273_v1  ;;  %v2270_v12 = vld [vmem:[#allocation2 + $0x28] sm:$0xff] }
0x2bf5   :  { %2886 = vmatmul.mubr.msk.f32.vlgmr.msra.gmra.mxu0 %vm280_vm2, %v2266_v3 }
0x2bf6   :  { %2888 = vmatprep.mubr.msk.f32.mxu0 %vm280_vm2, %v2267_v8 }
0x2bf9   :  { %2889 = vmatmul.mubr.msk.f32.gmra.mxu0 %vm280_vm2, %v2268_v9 }
0x2bfa   :  { %2891 = vmatprep.mubr.msk.f32.mxu0 %vm280_vm2, %v2269_v10 }
0x2bfd   :  { %2892 = vmatmul.mubr.msk.f32.gmra.mxu0 %vm280_vm2, %v2270_v12 }
0x2cad   :  { %v2119_v14 = vpop.f32.mrf.mxu0 }
0x2cae   :  { %v2130_v15 = vadd.f32 %v2119_v14, %v3446_v51  ;;  %v2123_v28 = vadd.f32 %v2119_v14, %v534_v27 }
0x2caf   :  { %v2865_v16 = vpop.f32.mrf.mxu0 }
0x2cb0   :  { %2132 = vrot.lane.b32.xlu1 %v2130_v15, %s3004_s29  ;;  %v2487_v29 = vmul.f32 -1.442695, %v2123_v28 }
0x2cb2   :  { %2990 = vpow2.f32 %v2487_v29 }
0x2cb5   :  { %v2887_v18 = vpop.f32.mrf.mxu0 }
0x2cb6   :  { %v2377_v19 = vadd.f32 %v2887_v18, %v3587_v17 }
0x2cb7   :  { %v2371_v53 = vpop.f32.mrf.mxu0 }
0x2cb8   :  { %2411 = vst.msk [vmem:[%s3656_s7 + $0x8] sm:$0xff] %vm62_vm0, %v2377_v19  ;;  %v2372_v33 = vadd.f32 %v3587_v17, %v2371_v53 }
0x2cb9   :  { %v2890_v20 = vpop.f32.mrf.mxu0 }
0x2cba   :  { %2410 = vst.msk [vmem:[%s3656_s7] sm:$0xff] %vm62_vm0, %v2372_v33  ;;  %v2387_v21 = vadd.f32 %v2890_v20, %v3587_v17 }
0x2cbb   :  { %v2381_v22 = vpop.f32.mrf.mxu0 }
0x2cbc   :  { %2413 = vst.msk [vmem:[%s3656_s7 + $0x18] sm:$0xff] %vm62_vm0, %v2387_v21  ;;  %v2382_v44 = vadd.f32 %v3587_v17, %v2381_v22 }
0x2cbd   :  { %v2893_v23 = vpop.f32.mrf.mxu0 }
0x2cbe   :  { %2412 = vst.msk [vmem:[%s3656_s7 + $0x10] sm:$0xff] %vm62_vm0, %v2382_v44  ;;  %v2397_v24 = vadd.f32 %v2893_v23, %v3587_v17 }
0x2cbf   :  { %v2391_v25 = vpop.f32.mrf.mxu0  ;;  %v2991_v49 = vpop.eup %2990 }
0x2cc0   :  { %2415 = vst.msk [vmem:[%s3656_s7 + $0x28] sm:$0xff] %vm62_vm0, %v2397_v24  ;;  %v2392_v26 = vadd.f32 %v3587_v17, %v2391_v25  ;;  %v2127_v30 = vadd.f32 1.0, %v2991_v49 }
0x2cc2   :  { %2414 = vst.msk [vmem:[%s3656_s7 + $0x20] sm:$0xff] %vm62_vm0, %v2392_v26  ;;  %2992 = vrcp.f32 %v2127_v30 }
0x2ccf   :  { %v2993_v31 = vpop.eup %2992 }
0x2d22   :  { %v2133_v32 = vpop.permute.xlu1 %2132 }
0x2d23   :  { %v2135_v34 = vmul.f32 %v2993_v31, %v2133_v32 }
0x2d25   :  { %2137 = vrot.lane.b32.xlu0 %v2135_v34, %s3004_s29 }
0x2d97   :  { %v2138_v4 = vpop.permute.xlu0 %2137 }
0x2d98   :  { %v2140_v35 = vadd.f32 %v2138_v4, %v534_v27 }
0x2d9a   :  { %2994 = vtanh.f32 %v2140_v35 }
0x2da7   :  { %v2995_v52 = vpop.eup %2994 }
0x2da8   :  { %v2142_v37 = vsub.f32 %v3561_v61, %v2995_v52 }
0x2daa   :  { %2144 = vrot.lane.b32.xlu1 %v2142_v37, %s3005_s17 }
0x2e1c   :  { %v2145_v54 = vpop.permute.xlu1 %2144 }
0x2e1d   :  { %v2147_v5 = vmul.f32 %v2993_v31, %v2145_v54 }
0x2e1f   :  { %2149 = vrot.lane.b32.xlu0 %v2147_v5, %s3006_s18 }
0x2e91   :  { %v2150_v43 = vpop.permute.xlu0 %2149 }
0x2e92   :  { %v2152_v45 = vadd.f32 %v2995_v52, %v2150_v43 }
0x2e94   :  { %2154 = vrot.lane.b32.xlu1 %v2152_v45, %s3004_s29 }
0x2f06   :  { %v2155_v46 = vpop.permute.xlu1 %2154 }
0x2f07   :  { %2157 = vst.msk [vmem:[#allocation2 + $0x30] sm:$0xff] %vm280_vm2, %v2155_v46  ;;  %2875 = vmatmul.mubr.msk.f32.vlgmr.msra.gmra.mxu1 %vm280_vm2, %v2155_v46 }
0x2f0e   :  { %v2271_v7 = vld [vmem:[#allocation2 + $0x30] sm:$0xff] }
0x2f0f   :  { %2894 = vmatprep.mubr.msk.f32.mxu0 %vm280_vm2, %v2271_v7 }
0x2fc7   :  { %v2226_v39 = vpop.f32.mrf.mxu1 }
0x2fc8   :  { %v2237_v48 = vadd.f32 %v2226_v39, %v3446_v51  ;;  %v2230_v50 = vadd.f32 %v2226_v39, %v539_v42 }
0x2fc9   :  { %v2876_v11 = vpop.f32.mrf.mxu1 }
0x2fca   :  { %2239 = vrot.lane.b32.xlu0 %v2237_v48, %s3004_s29  ;;  %v2489_v41 = vmul.f32 -1.442695, %v2230_v50 }
0x2fcc   :  { %2996 = vpow2.f32 %v2489_v41 }
0x2fd9   :  { %v2997_v13 = vpop.eup %2996 }
0x2fda   :  { %v2234_v6 = vadd.f32 1.0, %v2997_v13 }
0x2fdc   :  { %2998 = vrcp.f32 %v2234_v6 }
0x2fe9   :  { %v2999_v40 = vpop.eup %2998 }
0x303c   :  { %v2240_v56 = vpop.permute.xlu0 %2239 }
0x303d   :  { %v2242_v57 = vmul.f32 %v2999_v40, %v2240_v56 }
0x303f   :  { %2244 = vrot.lane.b32.xlu1 %v2242_v57, %s3004_s29 }
0x30b1   :  { %v2245_v36 = vpop.permute.xlu1 %2244 }
0x30b2   :  { %v2247_v55 = vadd.f32 %v2245_v36, %v539_v42 }
0x30b4   :  { %3000 = vtanh.f32 %v2247_v55 }
0x30c1   :  { %v3001_v51 = vpop.eup %3000 }
0x30c2   :  { %v2249_v47 = vsub.f32 %v2152_v45, %v3001_v51 }
0x30c4   :  { %2251 = vrot.lane.b32.xlu0 %v2249_v47, %s3005_s17 }
0x3136   :  { %v2252_v59 = vpop.permute.xlu0 %2251 }
0x3137   :  { %v2254_v2 = vmul.f32 %v2999_v40, %v2252_v59 }
0x3139   :  { %2256 = vrot.lane.b32.xlu1 %v2254_v2, %s3006_s18 }
0x31ab   :  { %v2257_v58 = vpop.permute.xlu1 %2256 }
0x31ac   :  { %v2259_v60 = vadd.f32 %v3001_v51, %v2257_v58 }
0x31ae   :  { %2261 = vrot.lane.b32.xlu0 %v2259_v60, %s3004_s29 }
0x3220   :  { %v2262_v61 = vpop.permute.xlu0 %2261 }
0x3221   :  { %2264 = vst.msk [vmem:[#allocation2 + $0x38] sm:$0xff] %vm280_vm2, %v2262_v61 }
0x3228   :  { %v2272_v62 = vld [vmem:[#allocation2 + $0x38] sm:$0xff] }
0x3229   :  { %2895 = vmatmul.mubr.msk.f32.gmra.mxu0 %vm280_vm2, %v2272_v62 }
0x32e9   :  { %v2896_v38 = vpop.f32.mrf.mxu0 }
0x32ea   :  { %v2407_v63 = vadd.f32 %v2896_v38, %v3587_v17 }
0x32eb   :  { %v2401_v0 = vpop.f32.mrf.mxu0 }
0x32ec   :  { %2417 = vst.msk [vmem:[%s3656_s7 + $0x38] sm:$0xff] %vm62_vm0, %v2407_v63  ;;  %v2402_v1 = vadd.f32 %v3587_v17, %v2401_v0 }
0x32ee   :  { %2416 = vst.msk [vmem:[%s3656_s7 + $0x30] sm:$0xff] %vm62_vm0, %v2402_v1 }

</bundles_post_ra>
